<compile_context>
chip_gen: v6e
topology: v6e:2x2x1
jax: 0.10.0
libtpu: 0.0.40
codegen_flags: <defaults>
</compile_context>

<pallas_src>
import functools

import numpy as np
import jax
import jax.numpy as jnp
from jax import lax
from jax.experimental import pallas as pl
from jax.experimental.pallas import tpu as pltpu


def _axis_weights(start, bin_sz, pooled, n_samples, size, transposed):
    """Summed, boundary-masked, 1/n-normalized separable bilinear weights.

    weight[p, g] = (1/n) * sum_s inside(c) * max(0, 1 - |clip(c, 0, size-1) - g|)
      with c = start + p*bin + (s + 0.5) * bin / n.
    Returns (pooled, size) f32, or (size, pooled) if `transposed`.
    """
    if transposed:
        p = lax.broadcasted_iota(jnp.int32, (1, pooled), 1).astype(jnp.float32)
        g = lax.broadcasted_iota(jnp.int32, (size, 1), 0).astype(jnp.float32)
        acc = jnp.zeros((size, pooled), jnp.float32)
    else:
        p = lax.broadcasted_iota(jnp.int32, (pooled, 1), 0).astype(jnp.float32)
        g = lax.broadcasted_iota(jnp.int32, (1, size), 1).astype(jnp.float32)
        acc = jnp.zeros((pooled, size), jnp.float32)
    for s in range(n_samples):  # static, small (= sampling_ratio)
        coord = start + p * bin_sz + ((s + 0.5) / n_samples) * bin_sz
        inside = ((coord >= -1.0) & (coord <= float(size))).astype(jnp.float32)
        cc = jnp.clip(coord, 0.0, float(size - 1))
        acc = acc + jnp.maximum(0.0, 1.0 - jnp.abs(cc - g)) * inside
    return acc * (1.0 / float(n_samples))


def _roi_align_kernel(batch_ref, oidx_ref, coords_ref, feat_ref, out_ref, *,
                      pooled_h, pooled_w, grid_h, grid_w,
                      spatial_scale, aligned, height, width):
    """One ROI per grid step.

    coords_ref : (4, K) f32 in SMEM (rows x1, y1, x2, y2).
    feat_ref   : (H, W, C) channels-last feature slab of this ROI's image.
    out_ref    : (PH, PW, C) pooled output (scatter-written to original slot).
    """
    del batch_ref, oidx_ref  # only used by the BlockSpec index_maps
    k = pl.program_id(0)
    offset = 0.5 if aligned else 0.0

    x1 = coords_ref[0, k] * spatial_scale - offset
    y1 = coords_ref[1, k] * spatial_scale - offset
    x2 = coords_ref[2, k] * spatial_scale - offset
    y2 = coords_ref[3, k] * spatial_scale - offset

    roi_w = x2 - x1
    roi_h = y2 - y1
    if not aligned:  # legacy behaviour: force minimum roi size of 1
        roi_w = jnp.maximum(roi_w, 1.0)
        roi_h = jnp.maximum(roi_h, 1.0)
    bin_h = roi_h / float(pooled_h)
    bin_w = roi_w / float(pooled_w)

    # Separable 1-D weights (tiny: PH*H + PW*W elements total).
    wyT = _axis_weights(y1, bin_h, pooled_h, grid_h, height, transposed=True)   # (H, PH)
    wx = _axis_weights(x1, bin_w, pooled_w, grid_w, width, transposed=False)    # (PW, W)

    feat = feat_ref[...]                                              # (H, W, C)

    # Stage 1 (MXU): contract over W, batched over H — canonical (B,M,K)x(B,K,N).
    wx_b = jnp.broadcast_to(wx[None, :, :],
                            (height, pooled_w, width)).astype(feat.dtype)
    mid = jnp.einsum("hqw,hwc->hqc", wx_b, feat,
                     preferred_element_type=jnp.float32,
                     precision=lax.Precision.HIGHEST)                 # (H, PW, C) f32

    # Stage 2 (VPU): contract over H, unrolled over the small static PH.
    for ph in range(pooled_h):
        col = wyT[:, ph:ph + 1][:, :, None]                           # (H, 1, 1)
        out_ref[ph] = jnp.sum(col * mid, axis=0).astype(out_ref.dtype)


def roi_align(feat, rois, output_size, spatial_scale=1.0,
              sampling_ratio=-1, aligned=False):
    if isinstance(output_size, int):
        output_size = (output_size, output_size)
    pooled_h, pooled_w = output_size
    if sampling_ratio <= 0:
        # TODO(synk): adaptive sampling grid (ceil(roi_size / pooled_size)) is
        # data-dependent per ROI; only fixed sampling_ratio > 0 is implemented.
        raise NotImplementedError("sampling_ratio <= 0 (adaptive) not supported")

    n, c, h, w = feat.shape
    k = rois.shape[0]

    batch_idx = rois[:, 0].astype(jnp.int32)
    coords = rois[:, 1:5].astype(jnp.float32)                 # (K, 4) = x1,y1,x2,y2

    # Sort ROIs by image index so consecutive grid steps keep the same feature
    # block resident (Pallas elides the HBM->VMEM DMA).  Outputs are scatter-
    # written back to their original slot via `orig_idx` (no unsort gather).
    order = jnp.argsort(batch_idx)
    batch_sorted = jnp.take(batch_idx, order).astype(jnp.int32)
    orig_idx = order.astype(jnp.int32)
    coords_sorted = jnp.take(coords, order, axis=0).T          # (4, K), long axis last

    # Channels-last slab: lane = C, contraction dims = (H, W).
    # TODO(synk): hoist this transpose out of the per-call path when RoIAlign
    # is invoked repeatedly on the same feature pyramid.
    feat_cl = jnp.transpose(feat, (0, 2, 3, 1))                # (N, H, W, C)

    elt = jnp.dtype(feat.dtype).itemsize
    feat_bytes = h * w * c * elt
    out_bytes = pooled_h * pooled_w * c * elt
    scratch_bytes = (h * pooled_w * c + h * pooled_w * w
                     + pooled_h * h + pooled_w * w) * 4

    try:
        vmem_cap = int(pltpu.get_tpu_info().vmem_capacity_bytes)
    except Exception:
        vmem_cap = 64 * 2**20                                  # v7x-safe fallback

    # Single-buffer the (rarely changing) feature block when it is large.
    single_buffer_feat = 2 * feat_bytes > vmem_cap // 2
    feat_buffers = 1 if single_buffer_feat else 2
    need = (feat_buffers * feat_bytes + 2 * out_bytes
            + 3 * scratch_bytes + (2 << 20))
    vmem_limit = int(min(int(vmem_cap * 0.85), max(32 * 2**20, need)))

    feat_index_map = lambda i, bidx, oidx: (bidx[i], 0, 0, 0)
    if single_buffer_feat:
        feat_spec = pl.BlockSpec((None, h, w, c), feat_index_map,
                                 pipeline_mode=pl.Buffered(1))
    else:
        feat_spec = pl.BlockSpec((None, h, w, c), feat_index_map)

    kernel = functools.partial(
        _roi_align_kernel,
        pooled_h=pooled_h, pooled_w=pooled_w,
        grid_h=int(sampling_ratio), grid_w=int(sampling_ratio),
        spatial_scale=float(spatial_scale), aligned=bool(aligned),
        height=h, width=w)

    grid_spec = pltpu.PrefetchScalarGridSpec(
        num_scalar_prefetch=2,
        grid=(k,),
        in_specs=[
            pl.BlockSpec(memory_space=pltpu.MemorySpace.SMEM),   # coords (4, K)
            feat_spec,
        ],
        out_specs=pl.BlockSpec((None, pooled_h, pooled_w, c),
                               lambda i, bidx, oidx: (oidx[i], 0, 0, 0)),
    )

    out_cl = pl.pallas_call(
        kernel,
        out_shape=jax.ShapeDtypeStruct((k, pooled_h, pooled_w, c), feat.dtype),
        grid_spec=grid_spec,
        compiler_params=pltpu.CompilerParams(
            dimension_semantics=("parallel",),
            vmem_limit_bytes=vmem_limit),
    )(batch_sorted, orig_idx, coords_sorted, feat_cl)

    return jnp.transpose(out_cl, (0, 3, 1, 2))                 # (K, C, PH, PW)


class RoIAlign:
    """Pallas/JAX equivalent of torchvision.ops.RoIAlign (forward only)."""

    def __init__(self, output_size, spatial_scale, sampling_ratio, aligned=False):
        self.output_size = output_size
        self.spatial_scale = spatial_scale
        self.sampling_ratio = sampling_ratio
        self.aligned = aligned

    def __call__(self, input, rois):
        return roi_align(input, rois, self.output_size, self.spatial_scale,
                         self.sampling_ratio, self.aligned)


# -------- pure-python reference (torchvision CPU kernel semantics) --------

def _bilinear(fm, y, x, H, W):
    if y < -1.0 or y > H or x < -1.0 or x > W:
        return np.zeros(fm.shape[0], dtype=np.float32)
    y = max(y, 0.0)
    x = max(x, 0.0)
    y_low = int(y)
    x_low = int(x)
    if y_low >= H - 1:
        y_high = y_low = H - 1
        y = float(y_low)
    else:
        y_high = y_low + 1
    if x_low >= W - 1:
        x_high = x_low = W - 1
        x = float(x_low)
    else:
        x_high = x_low + 1
    ly = y - y_low
    lx = x - x_low
    hy = 1.0 - ly
    hx = 1.0 - lx
    return (hy * hx * fm[:, y_low, x_low] + hy * lx * fm[:, y_low, x_high]
            + ly * hx * fm[:, y_high, x_low] + ly * lx * fm[:, y_high, x_high])


def _roi_align_ref(feat, rois, output_size, spatial_scale, sampling_ratio, aligned):
    feat = np.asarray(feat, dtype=np.float32)
    rois = np.asarray(rois, dtype=np.float32)
    PH, PW = output_size
    N, C, H, W = feat.shape
    K = rois.shape[0]
    off = 0.5 if aligned else 0.0
    out = np.zeros((K, C, PH, PW), dtype=np.float32)
    for k in range(K):
        b = int(rois[k, 0])
        x1 = rois[k, 1] * spatial_scale - off
        y1 = rois[k, 2] * spatial_scale - off
        x2 = rois[k, 3] * spatial_scale - off
        y2 = rois[k, 4] * spatial_scale - off
        rw = x2 - x1
        rh = y2 - y1
        if not aligned:
            rw = max(rw, 1.0)
            rh = max(rh, 1.0)
        bh = rh / PH
        bw = rw / PW
        gh = gw = sampling_ratio
        count = max(gh * gw, 1)
        for ph in range(PH):
            for pw_ in range(PW):
                acc = np.zeros(C, dtype=np.float32)
                for iy in range(gh):
                    y = y1 + ph * bh + (iy + 0.5) * bh / gh
                    for ix in range(gw):
                        x = x1 + pw_ * bw + (ix + 0.5) * bw / gw
                        acc += _bilinear(feat[b], y, x, H, W)
                out[k, :, ph, pw_] = acc / count
    return out


if __name__ == "__main__":
    key = jax.random.PRNGKey(0)
    kf, kb1, kb2 = jax.random.split(key, 3)

    N, C, H, W, K = 2, 4, 16, 16, 3
    feat = jax.random.normal(kf, (N, C, H, W), dtype=jnp.float32)

    # Boxes in pre-scale coordinates (spatial_scale=0.5 maps them into the 16x16 map).
    p1 = jax.random.uniform(kb1, (K, 2), minval=0.0, maxval=20.0)
    p2 = jax.random.uniform(kb2, (K, 2), minval=0.0, maxval=20.0)
    x1 = jnp.minimum(p1[:, 0], p2[:, 0])
    x2 = jnp.maximum(p1[:, 0], p2[:, 0]) + 4.0
    y1 = jnp.minimum(p1[:, 1], p2[:, 1])
    y2 = jnp.maximum(p1[:, 1], p2[:, 1]) + 4.0
    batch = jnp.array([0.0, 1.0, 0.0], dtype=jnp.float32)
    rois = jnp.stack([batch, x1, y1, x2, y2], axis=1)  # (K, 5)

    ok = True
    for aligned in (False, True):
        module = RoIAlign(output_size=(4, 4), spatial_scale=0.5,
                          sampling_ratio=2, aligned=aligned)
        out = jax.block_until_ready(module(feat, rois))
        ref = _roi_align_ref(feat, rois, (4, 4), 0.5, 2, aligned)
        ok &= (out.shape == (K, C, 4, 4))
        ok &= bool(np.allclose(np.asarray(out), ref, rtol=2e-3, atol=2e-3))

    print("KERNEL_OK" if ok else "KERNEL_MISMATCH")
</pallas_src>

<mosaic_0001>
module attributes {stable_mosaic.version = 11 : i64} {
  func.func @_roi_align_kernel(%arg0: i32, %arg1: memref<3xi32, #tpu.memory_space<smem>>, %arg2: memref<3xi32, #tpu.memory_space<smem>>, %arg3: memref<4x3xf32, #tpu.memory_space<smem>>, %arg4: memref<1x16x16x4xf32, #tpu.memory_space<vmem>>, %arg5: memref<1x4x4x4xf32, #tpu.memory_space<vmem>>) attributes {dimension_semantics = [#tpu.dimension_semantics<parallel>], iteration_bounds = array<i64: 3>, scalar_prefetch = 2 : i64, scratch_operands = 0 : i64, tpu.core_type = #tpu.core_type<tc>, window_params = [{transform_indices = @transform_0, window_bounds = array<i64: 4, 3>}, {transform_indices = @transform_1, window_bounds = array<i64: 1, 16, 16, 4>}, {transform_indices = @transform_2, window_bounds = array<i64: 1, 4, 4, 4>}]} {
    %c0 = arith.constant 0 : index
    %0 = arith.index_cast %arg0 : i32 to index
    %1 = memref.load %arg3[%c0, %0] : memref<4x3xf32, #tpu.memory_space<smem>>
    %cst = arith.constant 5.000000e-01 : f32
    %2 = arith.mulf %1, %cst : f32
    %cst_0 = arith.constant 0.000000e+00 : f32
    %3 = arith.subf %2, %cst_0 : f32
    %c1 = arith.constant 1 : index
    %4 = arith.index_cast %arg0 : i32 to index
    %5 = memref.load %arg3[%c1, %4] : memref<4x3xf32, #tpu.memory_space<smem>>
    %cst_1 = arith.constant 5.000000e-01 : f32
    %6 = arith.mulf %5, %cst_1 : f32
    %cst_2 = arith.constant 0.000000e+00 : f32
    %7 = arith.subf %6, %cst_2 : f32
    %c2 = arith.constant 2 : index
    %8 = arith.index_cast %arg0 : i32 to index
    %9 = memref.load %arg3[%c2, %8] : memref<4x3xf32, #tpu.memory_space<smem>>
    %cst_3 = arith.constant 5.000000e-01 : f32
    %10 = arith.mulf %9, %cst_3 : f32
    %cst_4 = arith.constant 0.000000e+00 : f32
    %11 = arith.subf %10, %cst_4 : f32
    %c3 = arith.constant 3 : index
    %12 = arith.index_cast %arg0 : i32 to index
    %13 = memref.load %arg3[%c3, %12] : memref<4x3xf32, #tpu.memory_space<smem>>
    %cst_5 = arith.constant 5.000000e-01 : f32
    %14 = arith.mulf %13, %cst_5 : f32
    %cst_6 = arith.constant 0.000000e+00 : f32
    %15 = arith.subf %14, %cst_6 : f32
    %16 = arith.subf %11, %3 : f32
    %17 = arith.subf %15, %7 : f32
    %cst_7 = arith.constant 1.000000e+00 : f32
    %18 = arith.maximumf %16, %cst_7 : f32
    %cst_8 = arith.constant 1.000000e+00 : f32
    %19 = arith.maximumf %17, %cst_8 : f32
    %cst_9 = arith.constant 4.000000e+00 : f32
    %20 = arith.divf %19, %cst_9 : f32
    %cst_10 = arith.constant 4.000000e+00 : f32
    %21 = arith.divf %18, %cst_10 : f32
    %22 = tpu.iota {dimensions = array<i32: 1>} : vector<1x4xi32>
    %23 = arith.sitofp %22 : vector<1x4xi32> to vector<1x4xf32>
    %24 = tpu.iota {dimensions = array<i32: 0>} : vector<16x1xi32>
    %25 = arith.sitofp %24 : vector<16x1xi32> to vector<16x1xf32>
    %cst_11 = arith.constant 0.000000e+00 : f32
    %26 = vector.broadcast %cst_11 : f32 to vector<16x4xf32>
    %27 = vector.broadcast %20 : f32 to vector<1x4xf32>
    %28 = arith.mulf %23, %27 : vector<1x4xf32>
    %29 = vector.broadcast %7 : f32 to vector<1x4xf32>
    %30 = arith.addf %29, %28 : vector<1x4xf32>
    %cst_12 = arith.constant 2.500000e-01 : f32
    %31 = arith.mulf %cst_12, %20 : f32
    %32 = vector.broadcast %31 : f32 to vector<1x4xf32>
    %33 = arith.addf %30, %32 : vector<1x4xf32>
    %cst_13 = arith.constant -1.000000e+00 : f32
    %34 = vector.broadcast %cst_13 : f32 to vector<1x4xf32>
    %35 = arith.cmpf oge, %33, %34 : vector<1x4xf32>
    %cst_14 = arith.constant 1.600000e+01 : f32
    %36 = vector.broadcast %cst_14 : f32 to vector<1x4xf32>
    %37 = arith.cmpf ole, %33, %36 : vector<1x4xf32>
    %38 = arith.andi %35, %37 : vector<1x4xi1>
    %39 = arith.extui %38 : vector<1x4xi1> to vector<1x4xi32>
    %40 = arith.sitofp %39 : vector<1x4xi32> to vector<1x4xf32>
    %cst_15 = arith.constant 0.000000e+00 : f32
    %cst_16 = arith.constant 1.500000e+01 : f32
    %41 = vector.broadcast %cst_15 : f32 to vector<1x4xf32>
    %42 = arith.maximumf %41, %33 : vector<1x4xf32>
    %43 = vector.broadcast %cst_16 : f32 to vector<1x4xf32>
    %44 = arith.minimumf %43, %42 : vector<1x4xf32>
    %45 = vector.broadcast %44 : vector<1x4xf32> to vector<16x4xf32>
    %46 = vector.broadcast %25 : vector<16x1xf32> to vector<16x4xf32>
    %47 = arith.subf %45, %46 : vector<16x4xf32>
    %48 = math.absf %47 : vector<16x4xf32>
    %cst_17 = arith.constant 1.000000e+00 : f32
    %49 = vector.broadcast %cst_17 : f32 to vector<16x4xf32>
    %50 = arith.subf %49, %48 : vector<16x4xf32>
    %cst_18 = arith.constant 0.000000e+00 : f32
    %51 = vector.broadcast %cst_18 : f32 to vector<16x4xf32>
    %52 = arith.maximumf %51, %50 : vector<16x4xf32>
    %53 = vector.broadcast %40 : vector<1x4xf32> to vector<16x4xf32>
    %54 = arith.mulf %52, %53 : vector<16x4xf32>
    %55 = arith.addf %26, %54 : vector<16x4xf32>
    %56 = vector.broadcast %20 : f32 to vector<1x4xf32>
    %57 = arith.mulf %23, %56 : vector<1x4xf32>
    %58 = vector.broadcast %7 : f32 to vector<1x4xf32>
    %59 = arith.addf %58, %57 : vector<1x4xf32>
    %cst_19 = arith.constant 7.500000e-01 : f32
    %60 = arith.mulf %cst_19, %20 : f32
    %61 = vector.broadcast %60 : f32 to vector<1x4xf32>
    %62 = arith.addf %59, %61 : vector<1x4xf32>
    %cst_20 = arith.constant -1.000000e+00 : f32
    %63 = vector.broadcast %cst_20 : f32 to vector<1x4xf32>
    %64 = arith.cmpf oge, %62, %63 : vector<1x4xf32>
    %cst_21 = arith.constant 1.600000e+01 : f32
    %65 = vector.broadcast %cst_21 : f32 to vector<1x4xf32>
    %66 = arith.cmpf ole, %62, %65 : vector<1x4xf32>
    %67 = arith.andi %64, %66 : vector<1x4xi1>
    %68 = arith.extui %67 : vector<1x4xi1> to vector<1x4xi32>
    %69 = arith.sitofp %68 : vector<1x4xi32> to vector<1x4xf32>
    %cst_22 = arith.constant 0.000000e+00 : f32
    %cst_23 = arith.constant 1.500000e+01 : f32
    %70 = vector.broadcast %cst_22 : f32 to vector<1x4xf32>
    %71 = arith.maximumf %70, %62 : vector<1x4xf32>
    %72 = vector.broadcast %cst_23 : f32 to vector<1x4xf32>
    %73 = arith.minimumf %72, %71 : vector<1x4xf32>
    %74 = vector.broadcast %73 : vector<1x4xf32> to vector<16x4xf32>
    %75 = vector.broadcast %25 : vector<16x1xf32> to vector<16x4xf32>
    %76 = arith.subf %74, %75 : vector<16x4xf32>
    %77 = math.absf %76 : vector<16x4xf32>
    %cst_24 = arith.constant 1.000000e+00 : f32
    %78 = vector.broadcast %cst_24 : f32 to vector<16x4xf32>
    %79 = arith.subf %78, %77 : vector<16x4xf32>
    %cst_25 = arith.constant 0.000000e+00 : f32
    %80 = vector.broadcast %cst_25 : f32 to vector<16x4xf32>
    %81 = arith.maximumf %80, %79 : vector<16x4xf32>
    %82 = vector.broadcast %69 : vector<1x4xf32> to vector<16x4xf32>
    %83 = arith.mulf %81, %82 : vector<16x4xf32>
    %84 = arith.addf %55, %83 : vector<16x4xf32>
    %cst_26 = arith.constant 5.000000e-01 : f32
    %85 = vector.broadcast %cst_26 : f32 to vector<16x4xf32>
    %86 = arith.mulf %84, %85 : vector<16x4xf32>
    %87 = tpu.iota {dimensions = array<i32: 0>} : vector<4x1xi32>
    %88 = arith.sitofp %87 : vector<4x1xi32> to vector<4x1xf32>
    %89 = tpu.iota {dimensions = array<i32: 1>} : vector<1x16xi32>
    %90 = arith.sitofp %89 : vector<1x16xi32> to vector<1x16xf32>
    %cst_27 = arith.constant 0.000000e+00 : f32
    %91 = vector.broadcast %cst_27 : f32 to vector<4x16xf32>
    %92 = vector.broadcast %21 : f32 to vector<4x1xf32>
    %93 = arith.mulf %88, %92 : vector<4x1xf32>
    %94 = vector.broadcast %3 : f32 to vector<4x1xf32>
    %95 = arith.addf %94, %93 : vector<4x1xf32>
    %cst_28 = arith.constant 2.500000e-01 : f32
    %96 = arith.mulf %cst_28, %21 : f32
    %97 = vector.broadcast %96 : f32 to vector<4x1xf32>
    %98 = arith.addf %95, %97 : vector<4x1xf32>
    %cst_29 = arith.constant -1.000000e+00 : f32
    %99 = vector.broadcast %cst_29 : f32 to vector<4x1xf32>
    %100 = arith.cmpf oge, %98, %99 : vector<4x1xf32>
    %cst_30 = arith.constant 1.600000e+01 : f32
    %101 = vector.broadcast %cst_30 : f32 to vector<4x1xf32>
    %102 = arith.cmpf ole, %98, %101 : vector<4x1xf32>
    %103 = arith.andi %100, %102 : vector<4x1xi1>
    %104 = arith.extui %103 : vector<4x1xi1> to vector<4x1xi32>
    %105 = arith.sitofp %104 : vector<4x1xi32> to vector<4x1xf32>
    %cst_31 = arith.constant 0.000000e+00 : f32
    %cst_32 = arith.constant 1.500000e+01 : f32
    %106 = vector.broadcast %cst_31 : f32 to vector<4x1xf32>
    %107 = arith.maximumf %106, %98 : vector<4x1xf32>
    %108 = vector.broadcast %cst_32 : f32 to vector<4x1xf32>
    %109 = arith.minimumf %108, %107 : vector<4x1xf32>
    %110 = vector.broadcast %109 : vector<4x1xf32> to vector<4x16xf32>
    %111 = vector.broadcast %90 : vector<1x16xf32> to vector<4x16xf32>
    %112 = arith.subf %110, %111 : vector<4x16xf32>
    %113 = math.absf %112 : vector<4x16xf32>
    %cst_33 = arith.constant 1.000000e+00 : f32
    %114 = vector.broadcast %cst_33 : f32 to vector<4x16xf32>
    %115 = arith.subf %114, %113 : vector<4x16xf32>
    %cst_34 = arith.constant 0.000000e+00 : f32
    %116 = vector.broadcast %cst_34 : f32 to vector<4x16xf32>
    %117 = arith.maximumf %116, %115 : vector<4x16xf32>
    %118 = vector.broadcast %105 : vector<4x1xf32> to vector<4x16xf32>
    %119 = arith.mulf %117, %118 : vector<4x16xf32>
    %120 = arith.addf %91, %119 : vector<4x16xf32>
    %121 = vector.broadcast %21 : f32 to vector<4x1xf32>
    %122 = arith.mulf %88, %121 : vector<4x1xf32>
    %123 = vector.broadcast %3 : f32 to vector<4x1xf32>
    %124 = arith.addf %123, %122 : vector<4x1xf32>
    %cst_35 = arith.constant 7.500000e-01 : f32
    %125 = arith.mulf %cst_35, %21 : f32
    %126 = vector.broadcast %125 : f32 to vector<4x1xf32>
    %127 = arith.addf %124, %126 : vector<4x1xf32>
    %cst_36 = arith.constant -1.000000e+00 : f32
    %128 = vector.broadcast %cst_36 : f32 to vector<4x1xf32>
    %129 = arith.cmpf oge, %127, %128 : vector<4x1xf32>
    %cst_37 = arith.constant 1.600000e+01 : f32
    %130 = vector.broadcast %cst_37 : f32 to vector<4x1xf32>
    %131 = arith.cmpf ole, %127, %130 : vector<4x1xf32>
    %132 = arith.andi %129, %131 : vector<4x1xi1>
    %133 = arith.extui %132 : vector<4x1xi1> to vector<4x1xi32>
    %134 = arith.sitofp %133 : vector<4x1xi32> to vector<4x1xf32>
    %cst_38 = arith.constant 0.000000e+00 : f32
    %cst_39 = arith.constant 1.500000e+01 : f32
    %135 = vector.broadcast %cst_38 : f32 to vector<4x1xf32>
    %136 = arith.maximumf %135, %127 : vector<4x1xf32>
    %137 = vector.broadcast %cst_39 : f32 to vector<4x1xf32>
    %138 = arith.minimumf %137, %136 : vector<4x1xf32>
    %139 = vector.broadcast %138 : vector<4x1xf32> to vector<4x16xf32>
    %140 = vector.broadcast %90 : vector<1x16xf32> to vector<4x16xf32>
    %141 = arith.subf %139, %140 : vector<4x16xf32>
    %142 = math.absf %141 : vector<4x16xf32>
    %cst_40 = arith.constant 1.000000e+00 : f32
    %143 = vector.broadcast %cst_40 : f32 to vector<4x16xf32>
    %144 = arith.subf %143, %142 : vector<4x16xf32>
    %cst_41 = arith.constant 0.000000e+00 : f32
    %145 = vector.broadcast %cst_41 : f32 to vector<4x16xf32>
    %146 = arith.maximumf %145, %144 : vector<4x16xf32>
    %147 = vector.broadcast %134 : vector<4x1xf32> to vector<4x16xf32>
    %148 = arith.mulf %146, %147 : vector<4x16xf32>
    %149 = arith.addf %120, %148 : vector<4x16xf32>
    %cst_42 = arith.constant 5.000000e-01 : f32
    %150 = vector.broadcast %cst_42 : f32 to vector<4x16xf32>
    %151 = arith.mulf %149, %150 : vector<4x16xf32>
    %c0_43 = arith.constant 0 : index
    %c0_44 = arith.constant 0 : index
    %c0_45 = arith.constant 0 : index
    %c0_46 = arith.constant 0 : index
    %152 = vector.load %arg4[%c0_43, %c0_44, %c0_45, %c0_46] : memref<1x16x16x4xf32, #tpu.memory_space<vmem>>, vector<1x16x16x4xf32>
    %153 = vector.shape_cast %152 : vector<1x16x16x4xf32> to vector<16x16x4xf32>
    %154 = vector.shape_cast %151 : vector<4x16xf32> to vector<1x4x16xf32>
    %155 = vector.shape_cast %154 : vector<1x4x16xf32> to vector<1x4x16xf32>
    %156 = vector.broadcast %155 : vector<1x4x16xf32> to vector<16x4x16xf32>
    "tpu.trace_start"() <{level = 10 : i32, message = "hqw,hwc->hqc"}> : () -> ()
    %cst_47 = arith.constant dense<0.000000e+00> : vector<16x4x4xf32>
    %157 = tpu.matmul %156, %153, %cst_47 {dimension_numbers = #tpu.dot_dimension_numbers<[2], [1], [1], [2], [0, 0, 0, 1, 1, 2], [0], [0]>, precision = #tpu.contract_precision<fp32>} : vector<16x4x16xf32>, vector<16x16x4xf32>, vector<16x4x4xf32> -> vector<16x4x4xf32>
    "tpu.trace_stop"() : () -> ()
    %158 = vector.extract_strided_slice %86 {offsets = [0, 0], sizes = [16, 1], strides = [1, 1]} : vector<16x4xf32> to vector<16x1xf32>
    %159 = vector.shape_cast %158 : vector<16x1xf32> to vector<16x1x1xf32>
    %160 = vector.broadcast %159 : vector<16x1x1xf32> to vector<16x4x4xf32>
    %161 = arith.mulf %160, %157 : vector<16x4x4xf32>
    %cst_48 = arith.constant dense<0.000000e+00> : vector<4x4xf32>
    %162 = vector.multi_reduction <add>, %161, %cst_48 [0] : vector<16x4x4xf32> to vector<4x4xf32>
    %c0_49 = arith.constant 0 : index
    %c0_50 = arith.constant 0 : index
    %c0_51 = arith.constant 0 : index
    %c0_52 = arith.constant 0 : index
    %163 = vector.load %arg5[%c0_49, %c0_50, %c0_51, %c0_52] : memref<1x4x4x4xf32, #tpu.memory_space<vmem>>, vector<1x1x4x4xf32>
    %164 = vector.shape_cast %163 : vector<1x1x4x4xf32> to vector<4x4xf32>
    %165 = vector.shape_cast %162 : vector<4x4xf32> to vector<1x1x4x4xf32>
    tpu.vector_store %arg5[%c0_49, %c0_50, %c0_51, %c0_52], %165 {strides = array<i32>} : memref<1x4x4x4xf32, #tpu.memory_space<vmem>>, vector<1x1x4x4xf32>,
    %166 = vector.extract_strided_slice %86 {offsets = [0, 1], sizes = [16, 1], strides = [1, 1]} : vector<16x4xf32> to vector<16x1xf32>
    %167 = vector.shape_cast %166 : vector<16x1xf32> to vector<16x1x1xf32>
    %168 = vector.broadcast %167 : vector<16x1x1xf32> to vector<16x4x4xf32>
    %169 = arith.mulf %168, %157 : vector<16x4x4xf32>
    %cst_53 = arith.constant dense<0.000000e+00> : vector<4x4xf32>
    %170 = vector.multi_reduction <add>, %169, %cst_53 [0] : vector<16x4x4xf32> to vector<4x4xf32>
    %c0_54 = arith.constant 0 : index
    %c1_55 = arith.constant 1 : index
    %c0_56 = arith.constant 0 : index
    %c0_57 = arith.constant 0 : index
    %171 = vector.load %arg5[%c0_54, %c1_55, %c0_56, %c0_57] : memref<1x4x4x4xf32, #tpu.memory_space<vmem>>, vector<1x1x4x4xf32>
    %172 = vector.shape_cast %171 : vector<1x1x4x4xf32> to vector<4x4xf32>
    %173 = vector.shape_cast %170 : vector<4x4xf32> to vector<1x1x4x4xf32>
    tpu.vector_store %arg5[%c0_54, %c1_55, %c0_56, %c0_57], %173 {strides = array<i32>} : memref<1x4x4x4xf32, #tpu.memory_space<vmem>>, vector<1x1x4x4xf32>,
    %174 = vector.extract_strided_slice %86 {offsets = [0, 2], sizes = [16, 1], strides = [1, 1]} : vector<16x4xf32> to vector<16x1xf32>
    %175 = vector.shape_cast %174 : vector<16x1xf32> to vector<16x1x1xf32>
    %176 = vector.broadcast %175 : vector<16x1x1xf32> to vector<16x4x4xf32>
    %177 = arith.mulf %176, %157 : vector<16x4x4xf32>
    %cst_58 = arith.constant dense<0.000000e+00> : vector<4x4xf32>
    %178 = vector.multi_reduction <add>, %177, %cst_58 [0] : vector<16x4x4xf32> to vector<4x4xf32>
    %c0_59 = arith.constant 0 : index
    %c2_60 = arith.constant 2 : index
    %c0_61 = arith.constant 0 : index
    %c0_62 = arith.constant 0 : index
    %179 = vector.load %arg5[%c0_59, %c2_60, %c0_61, %c0_62] : memref<1x4x4x4xf32, #tpu.memory_space<vmem>>, vector<1x1x4x4xf32>
    %180 = vector.shape_cast %179 : vector<1x1x4x4xf32> to vector<4x4xf32>
    %181 = vector.shape_cast %178 : vector<4x4xf32> to vector<1x1x4x4xf32>
    tpu.vector_store %arg5[%c0_59, %c2_60, %c0_61, %c0_62], %181 {strides = array<i32>} : memref<1x4x4x4xf32, #tpu.memory_space<vmem>>, vector<1x1x4x4xf32>,
    %182 = vector.extract_strided_slice %86 {offsets = [0, 3], sizes = [16, 1], strides = [1, 1]} : vector<16x4xf32> to vector<16x1xf32>
    %183 = vector.shape_cast %182 : vector<16x1xf32> to vector<16x1x1xf32>
    %184 = vector.broadcast %183 : vector<16x1x1xf32> to vector<16x4x4xf32>
    %185 = arith.mulf %184, %157 : vector<16x4x4xf32>
    %cst_63 = arith.constant dense<0.000000e+00> : vector<4x4xf32>
    %186 = vector.multi_reduction <add>, %185, %cst_63 [0] : vector<16x4x4xf32> to vector<4x4xf32>
    %c0_64 = arith.constant 0 : index
    %c3_65 = arith.constant 3 : index
    %c0_66 = arith.constant 0 : index
    %c0_67 = arith.constant 0 : index
    %187 = vector.load %arg5[%c0_64, %c3_65, %c0_66, %c0_67] : memref<1x4x4x4xf32, #tpu.memory_space<vmem>>, vector<1x1x4x4xf32>
    %188 = vector.shape_cast %187 : vector<1x1x4x4xf32> to vector<4x4xf32>
    %189 = vector.shape_cast %186 : vector<4x4xf32> to vector<1x1x4x4xf32>
    tpu.vector_store %arg5[%c0_64, %c3_65, %c0_66, %c0_67], %189 {strides = array<i32>} : memref<1x4x4x4xf32, #tpu.memory_space<vmem>>, vector<1x1x4x4xf32>,
    return
  }
  func.func @transform_0(%arg0: i32, %arg1: memref<3xi32, #tpu.memory_space<smem>>, %arg2: memref<3xi32, #tpu.memory_space<smem>>) -> (i32, i32) {
    %c0_i32 = arith.constant 0 : i32
    %c0_i32_0 = arith.constant 0 : i32
    %c0_i32_1 = arith.constant 0 : i32
    return %c0_i32, %c0_i32_0 : i32, i32
  }
  func.func @transform_1(%arg0: i32, %arg1: memref<3xi32, #tpu.memory_space<smem>>, %arg2: memref<3xi32, #tpu.memory_space<smem>>) -> (i32, i32, i32, i32) {
    %0 = arith.index_cast %arg0 : i32 to index
    %1 = memref.load %arg1[%0] : memref<3xi32, #tpu.memory_space<smem>>
    %c0_i32 = arith.constant 0 : i32
    %c0_i32_0 = arith.constant 0 : i32
    %c0_i32_1 = arith.constant 0 : i32
    %c0_i32_2 = arith.constant 0 : i32
    return %1, %c0_i32, %c0_i32_0, %c0_i32_1 : i32, i32, i32, i32
  }
  func.func @transform_2(%arg0: i32, %arg1: memref<3xi32, #tpu.memory_space<smem>>, %arg2: memref<3xi32, #tpu.memory_space<smem>>) -> (i32, i32, i32, i32) {
    %0 = arith.index_cast %arg0 : i32 to index
    %1 = memref.load %arg2[%0] : memref<3xi32, #tpu.memory_space<smem>>
    %c0_i32 = arith.constant 0 : i32
    %c0_i32_0 = arith.constant 0 : i32
    %c0_i32_1 = arith.constant 0 : i32
    %c0_i32_2 = arith.constant 0 : i32
    return %1, %c0_i32, %c0_i32_0, %c0_i32_1 : i32, i32, i32, i32
  }
}

</mosaic_0001>

<bundles_post_ra>
// kernel: tpu_custom_call.1
= control target key start
LH: loop header
LB: loop body
LE: loop exit
PB: predicated region body
PF: predicated region fallthrough
CT: control target
= control target key end

     0   :  { %s11225_s0 = inlined_call_operand.vmem [shape: s32[3], index: 0, kind: input, shape index: {}]   ;;  %s11226_s2 = inlined_call_operand.vmem [shape: f32[4,3], index: 2, kind: input, shape index: {}]   ;;  %s11227_s3 = inlined_call_operand.vmem [shape: f32[2,16,16,4], index: 3, kind: input, shape index: {}]   ;;  %s11228_s4 = inlined_call_operand.hbm [shape: f32[3,4,4,4], index: 4, kind: output, shape index: {}]   ;;  %s11229_s1 = inlined_call_operand.vmem [shape: s32[3], index: 1, kind: input, shape index: {}]  }
   0x1   :  { %s9_s17 = sshll.u32 %s11225_s0, 4  ;;  %s13_s20 = sshll.u32 %s11229_s1, 4  ;;  %s10_s17 = int_to_ptr.vmem [resolvable:$true] %s9_s17  ;;  %s14_s20 = int_to_ptr.vmem [resolvable:$true] %s13_s20 }
   0x2   :  { %s9463_s21 = scalar_lea.vmem %s10_s17, 16  ;;  %p9468_p1 = scmp.lt.s32.totalorder %s10_s17, %s10_s17 }
   0x3   :  { %p9464_p0 = scmp.ne.s32.totalorder %s10_s17, %s9463_s21  ;;  %p9469_p2 = scmp.lt.s32.totalorder %s9463_s21, %s9463_s21 }
   0x5   :  { %p9470_p3 = por %p9469_p2, %p9468_p1 }
   0x7   :  { %p9471_p4 = pnand %p9470_p3, %p9464_p0 }
   0x9   :  { %9474 = shalt.err (!%p9471_p4)  }
   0xa   :  { %s9570_s22 = smov [#allocation3]   ;;  %s9475_s23 = scalar_lea.vmem %s14_s20, 16 }
   0xb   :  { %12 = dma.vmem_to_smem %s10_s17, 16, %s9570_s22, [#allocation2] }
   0xc   :  { %p9476_p5 = scmp.ne.s32.totalorder %s14_s20, %s9475_s23  ;;  %p9480_p6 = scmp.lt.s32.totalorder %s14_s20, %s14_s20 }
   0xd   :  { %p9481_p7 = scmp.lt.s32.totalorder %s9475_s23, %s9475_s23 }
   0xf   :  { %p9482_p8 = por %p9481_p7, %p9480_p6 }
  0x11   :  { %p9483_p9 = pnand %p9482_p8, %p9476_p5 }
  0x13   :  { %9486 = shalt.err (!%p9483_p9)  }
  0x14   :  { %s9571_s0 = smov [#allocation4]  }
  0x15   :  { %16 = dma.vmem_to_smem %s14_s20, 16, %s9571_s0, [#allocation2] }
  0x16   :  { %9544 = dma.done.wait [#allocation2], 32 }
  0x17   :  { %9545 = vsyncadd [#allocation2], 4294967264 }
  0x18   :  { %18 = sfence }
  0x19   :  { %19 = vsyncpa [#allocation7], 0 }
  0x1a   :  { %20 = vsyncpa [#allocation6], 0 }
  0x1b   :  { %22 = vsyncpa [#allocation6 + $0x1], 0  ;;  %s9615_s1 = smov 0   ;;  %s9617_s24 = smov 0  }
  0x1c   :  { %s9619_s25 = smov 0   ;;  %s9621_s26 = smov 0  }
  0x1d LB: > { %s9636_s27 = sadd.s32 4294967295, %s9568_s26   ;;  %s8389_s28 = sadd.s32 4294967294, %s9568_s26   ;;  %s9568_s26 = sphi %s9621_s26, %s11257_s26   ;;  %s9564_s25 = sphi %s9619_s25, %s11256_s25   ;;  %s9560_s24 = sphi %s9617_s24, %s11255_s24   ;;  %s9556_s1 = sphi %s9615_s1, %s11254_s1  }
  0x1e   : > { %s9640_s29 = sadd.s32 1, %s9568_s26   ;;  %s81_s30 = sld [smem:[#allocation4 + %s9568_s26]] }
  0x1f   : > { %s82_s5 = sld [smem:[#allocation4 + %s9640_s29]]  ;;  %s86_s6 = sadd.s32 1, %s9564_s25 }
  0x20   : > { %p96_p10 = scmp.ne.s32.totalorder %s9564_s25, %s9560_s24  ;;  %p97_p11 = scmp.eq.s32.totalorder %s9636_s27, 2 }
  0x21   : > { %p102_p12 = scmp.ne.s32.totalorder %s9560_s24, %s9556_s1  ;;  %p103_p13 = scmp.eq.s32.totalorder %s8389_s28, 2 }
  0x22   : > { %p9650_p0 = por %p97_p11, %p96_p10  ;;  %p8390_p1 = scmp.ge.s32.totalorder %s9568_s26, 1 }
  0x23   : > { %p9655_p2 = por %p103_p13, %p102_p12  ;;  %p110_p3 = scmp.lt.s32.totalorder %s9568_s26, 4 }
  0x24   : > { %p9397_p4 = scmp.eq.s32.totalorder %s9636_s27, 0  ;;  %s123_s13 = sshll.u32 %s11226_s2, 4  ;;  %s124_s13 = int_to_ptr.vmem [resolvable:$true] %s123_s13 }
  0x25   : > { %s11235_s8 = scalar_select %p9655_p2, 1, 0 }
  0x26   : > { %s83_s9 = ssub.s32 %s81_s30, %s82_s5  ;;  %p9661_p5 = pnand %p8390_p1, %p110_p3 }
  0x27   : > { %p84_p6 = scmp.eq.s32.totalorder %s83_s9, 0  ;;  %s9487_s15 = scalar_lea.vmem %s124_s13, 64 }
  0x28   : > { %p9389_p7 = pneg %p9661_p5  ;;  %p9488_p9 = scmp.ne.s32.totalorder %s124_s13, %s9487_s15 }
  0x29   : > { %s9671_s14 = scalar_select %p84_p6, %s9564_s25, %s86_s6  }
  0x2a   : > { %p9390_p8 = pnand %p9397_p4, %p9389_p7  ;;  %p9495_p13 = scmp.lt.s32.totalorder %s124_s13, %s124_s13 }
  0x2b   : > { %p9496_p1 = scmp.lt.s32.totalorder %s9487_s15, %s9487_s15 }
  0x2c   : > { %p9489_p10 = pneg %p9390_p8 }
  0x2d   : > { %p9497_p3 = por %p9496_p1, %p9495_p13 }
  0x2e   : > { %p9490_p11 = pnand %p9489_p10, %p9488_p9 }
  0x30   : > { %p9491_p12 = pneg %p9490_p11 }
  0x32   : > { %p9498_p2 = pnand %p9497_p3, %p9491_p12 }
  0x34   : > { %9501 = shalt.err (!%p9498_p2)
}
  0x35   : > { %s9572_s16 = smov [#allocation5]   ;;  %146 = sbr.rel (%p9661_p5) target bundleno = 642 (0x282), region = 28 }
  0x36   : > { %9392 = dma.vmem_to_smem (!%p9390_p8), %s124_s13, 64, %s9572_s16, [#allocation7]  }
  0x3a   : > { %9547 = dma.done.wait (%p9397_p4), [#allocation7], 64  }
  0x3b   : > { %9549 = vsyncadd (%p9397_p4), [#allocation7], 4294967232 }
  0x3c   : > { %152 = sfence }
  0x3d   : > { %s170_s17 = sld [smem:[#allocation3 + %s9636_s27]]  ;;  %s180_s18 = sshra.s32 %s9636_s27, 7  ;;  %v9573_v0 = vmov 0.0   ;;  %v9574_v1 = vmov 0   ;;  %vm9575_vm0 = vmmov 0   ;;  %v9576_v2 = vmov 1  }
  0x3e   : > { %8709 = vmatprep.subr.mxu0 %v9573_v0  ;;  %8716 = vmatprep.subr.mxu1 %v9573_v0  ;;  %s8414_s19 = sshll.u32 %s180_s18, 7  ;;  %s185_s20 = sand.u32 127, %s9636_s27  ;;  %v209_v3 = vlaneseq  ;;  %v9578_v40 = vmov 1966171168   ;;  %vm336_vm13 = vcmask 130048   ;;  %vm7928_vm14 = vcmask 27648  }
  0x3f   : > { %9445 = vset.pattern.permute.xlu0 %v9574_v1  ;;  %s8415_s21 = sadd.s32 128, %s8414_s19  ;;  %s8417_s22 = sadd.s32 256, %s8414_s19  ;;  %8713 = vmatprep.mubr.msk.f32.mxu0 %vm9575_vm0, %v9573_v0  ;;  %v7688_v41 = vunpack.c.l.s4 %v9578_v40 }
  0x40   : > { %s186_s23 = sadd.s32 %s8415_s21, %s185_s20  ;;  %s191_s0 = sadd.s32 %s8417_s22, %s185_s20  ;;  %8720 = vmatprep.mubr.msk.f32.mxu1 %vm9575_vm0, %v9573_v0  ;;  %9447 = vset.pattern.permute.xlu1 %v9576_v2  ;;  %v210_v5 = vand.u32 127, %v209_v3  ;;  %v9707_v8 = vshrl.u32 %v209_v3, 7 }
  0x41   : > { %s9692_s28 = sld [smem:[#allocation5 + %s186_s23]]  ;;  %s8419_s30 = sadd.s32 384, %s8414_s19  ;;  %v7689_v59 = vunpack.c.0.s8 %v7688_v41 }
  0x42   : > { %s192_s5 = sld [smem:[#allocation5 + %s191_s0]]  ;;  %s196_s6 = sadd.s32 %s8419_s30, %s185_s20  ;;  %v9722_v12 = vcvt.s32.f32 %v210_v5  ;;  %v9726_v14 = vcvt.s32.f32 %v9707_v8  ;;  %v214_v29 = vadd.s32 8, %v9707_v8 }
  0x43   : > { %p171_p2 = scmp.lt.s32.totalorder %s170_s17, 1  ;;  %s197_s9 = sld [smem:[#allocation5 + %s196_s6]] }
  0x44   : > { %s9695_s10 = sld [smem:[#allocation5 + %s9636_s27]]  ;;  %s9577_s22 = smov 1.0   ;;  %v216_v38 = vcvt.s32.f32 %v214_v29  ;;  %v9760_v29 = vsub.s32 %v7689_v59, %v9707_v8 }
  0x45   : > { %s11259_s17 = smov (!%p171_p2, %s170_s17), 1  ;;  %s11261_s27 = smov (!%p9650_p0, %s9636_s27), 0 }
  0x46   : > { %s8413_s11 = sshll.u32 %s11259_s17, 8 }
  0x47   : > { %s188_s12 = smul.f32 0.5, %s9692_s28  ;;  %s9701_s16 = scalar_lea.vmem %s11227_s3, %s8413_s11 }
  0x48   : > { %s193_s18 = smul.f32 0.5, %s192_s5  ;;  %v305_v4 = vld [vmem:[%s9701_s16 + $0x8] sm:$0xff]  ;;  %v304_v6 = vld [vmem:[%s9701_s16] sm:$0xff] }
  0x49   : > { %s198_s19 = smul.f32 0.5, %s197_s9  ;;  %v9705_v7 = vand.u32 4294901760, %v305_v4  ;;  %v9710_v9 = vand.u32 4294901760, %v304_v6  ;;  %v219_v18 = vstv %s188_s12 }
  0x4a   : > { %s179_s20 = smul.f32 0.5, %s9695_s10 }
  0x4b   : > { %s200_s17 = ssub.f32 %s198_s19, %s188_s12  ;;  %8710 = vmatpush3.msra.mxu0 %v9705_v7  ;;  %v9716_v10 = vsub.f32 %v305_v4, %v9705_v7  ;;  %v9719_v11 = vsub.f32 %v304_v6, %v9710_v9  ;;  %s167_s12 = sand.u32 1, %s9560_s24  }
  0x4c   : > { %s199_s21 = ssub.f32 %s193_s18, %s179_s20  ;;  %8711 = vmatprep.subr.mxu0 %v9573_v0  ;;  %v269_v22 = vstv %s179_s20  ;;  %s8395_s15 = sshll.u32 %s167_s12, 4 }
  0x4d   : > { %s202_s23 = smax.f32 %s9577_s22, %s200_s17  ;;  %v448_v13 = vand.u32 4294901760, %v9716_v10  ;;  %8712 = vmatpush3.msra.mxu0 %v9710_v9  ;;  %v455_v15 = vand.u32 4294901760, %v9719_v11 }
  0x4e   : > { %s205_s0 = smul.f32 0.25, %s202_s23  ;;  %s201_s30 = smax.f32 %s9577_s22, %s199_s21  ;;  %8723 = vmatprep.subr.mxu0 %v9573_v0 }
  0x4f   : > { %s208_s5 = smul.f32 0.25, %s201_s30  ;;  %v449_v16 = vsub.f32 %v9716_v10, %v448_v13  ;;  %v456_v19 = vsub.f32 %v9719_v11, %v455_v15  ;;  %s11185_s21 = scalar_lea.sflag [#allocation6], %s167_s12 }
  0x50   : > { %v217_v17 = vstv %s205_s0  ;;  %s221_s6 = smul.f32 0.25, %s205_s0  ;;  %s9581_s23 = smov [#allocation8]  }
  0x51   : > { %v218_v20 = vmul.f32 %v217_v17, %v9722_v12  ;;  %s243_s9 = smul.f32 0.75, %s205_s0  ;;  %v267_v21 = vstv %s208_s5  ;;  %v450_v23 = vand.u32 4294901760, %v449_v16  ;;  %v457_v26 = vand.u32 4294901760, %v456_v19  ;;  %s9506_s0 = sshll.u32 %s9581_s23, 4  ;;  %s9507_s0 = int_to_ptr.vmem [resolvable:$false] %s9506_s0 }
  0x52   : > { %v222_v24 = vstv %s221_s6  ;;  %v268_v25 = vmul.f32 %v267_v21, %v9726_v14  ;;  %s271_s10 = smul.f32 0.25, %s208_s5  ;;  %s9508_s30 = scalar_lea.vmem %s9507_s0, 512 }
  0x53   : > { %v220_v27 = vadd.f32 %v219_v18, %v218_v20  ;;  %v244_v28 = vstv %s243_s9  ;;  %s287_s28 = smul.f32 0.75, %s208_s5  ;;  %8717 = vmatpush3.msra.mxu1 %v450_v23 }
  0x54   : > { %v270_v30 = vadd.f32 %v269_v22, %v268_v25  ;;  %v272_v31 = vstv %s271_s10  ;;  %8718 = vmatprep.subr.mxu1 %v9573_v0  ;;  %s9385_s11 = scalar_select %p9650_p0, [#allocation4], [#allocation9] }
  0x55   : > { %v223_v32 = vadd.f32 %v222_v24, %v220_v27  ;;  %v245_v33 = vadd.f32 %v244_v28, %v220_v27  ;;  %v288_v34 = vstv %s287_s28  ;;  %8719 = vmatpush3.msra.mxu1 %v457_v26 }
  0x56   : > { %v273_v35 = vadd.f32 %v272_v31, %v270_v30  ;;  %v289_v36 = vadd.f32 %v288_v34, %v270_v30  ;;  %8730 = vmatprep.subr.mxu1 %v9573_v0  ;;  %s11147_s13 = sld [smem:[%s9385_s11 + %s11261_s27]]  ;;  %s169_s27 = scalar_lea.vmem [#allocation8], %s8395_s15 }
  0x57   : > { %v229_v37 = vmax.f32 %v223_v32, 0.0  ;;  %vm224_vm1 = vcmp.ge.f32.partialorder %v223_v32, -1.0  ;;  %v251_v39 = vmax.f32 %v245_v33, 0.0  ;;  %vm225_vm2 = vcmp.le.f32.partialorder %v223_v32, 16.0 }
  0x58   : > { %vm246_vm3 = vcmp.ge.f32.partialorder %v245_v33, -1.0  ;;  %v279_v43 = vmax.f32 %v273_v35, 0.0  ;;  %vm247_vm4 = vcmp.le.f32.partialorder %v245_v33, 16.0  ;;  %vm274_vm5 = vcmp.ge.f32.partialorder %v273_v35, -1.0  ;;  %vm226_vm8 = vmand %vm224_vm1, %vm225_vm2 }
  0x59   : > { %v230_v42 = vmin.f32 %v229_v37, 15.0  ;;  %v252_v44 = vmin.f32 %v251_v39, 15.0  ;;  %v295_v45 = vmax.f32 %v289_v36, 0.0  ;;  %vm275_vm6 = vcmp.le.f32.partialorder %v273_v35, 16.0  ;;  %vm248_vm10 = vmand %vm246_vm3, %vm247_vm4  ;;  %v307_v39 = vld [vmem:[%s9701_s16 + $0x18] sm:$0xff] }
  0x5a   : > { %v280_v47 = vmin.f32 %v279_v43, 15.0  ;;  %vm290_vm7 = vcmp.ge.f32.partialorder %v289_v36, -1.0  ;;  %vm291_vm9 = vcmp.le.f32.partialorder %v289_v36, 16.0  ;;  %vm276_vm11 = vmand %vm274_vm5, %vm275_vm6  ;;  %v8401_v62 = vsel %vm226_vm8, 1.0, %v9573_v0 }
  0x5b   : > { %v231_v46 = vsub.f32 %v230_v42, %v9726_v14  ;;  %v232_v48 = vsub.f32 %v230_v42, %v216_v38  ;;  %v253_v49 = vsub.f32 %v252_v44, %v9726_v14  ;;  %v296_v50 = vmin.f32 %v295_v45, 15.0  ;;  %vm292_vm12 = vmand %vm290_vm7, %vm291_vm9 }
  0x5c   : > { %v254_v51 = vsub.f32 %v252_v44, %v216_v38  ;;  %v281_v53 = vsub.f32 %v280_v47, %v9722_v12  ;;  %v8402_v6 = vsel %vm248_vm10, 1.0, %v9573_v0  ;;  %v8403_v17 = vsel %vm276_vm11, 1.0, %v9573_v0  ;;  %s8420_s18 = sshll.u32 %s11147_s13, 8 }
  0x5d   : > { %v233_v52 = vand.u32 2147483647, %v231_v46  ;;  %v234_v54 = vand.u32 2147483647, %v232_v48  ;;  %v255_v55 = vand.u32 2147483647, %v253_v49  ;;  %v297_v56 = vsub.f32 %v296_v50, %v9722_v12  ;;  %s11177_s17 = scalar_lea.hbm %s11228_s4, %s8420_s18 }
  0x5e   : > { %v256_v57 = vand.u32 2147483647, %v254_v51  ;;  %v282_v60 = vand.u32 2147483647, %v281_v53  ;;  %v8404_v22 = vsel %vm292_vm12, 1.0, %v9573_v0  ;;  %v9766_v36 = vsub.s32 0, %v9707_v8 }
  0x5f   : > { %v235_v58 = vsub.f32 1.0, %v233_v52  ;;  %v236_v61 = vsub.f32 1.0, %v234_v54  ;;  %v257_v63 = vsub.f32 1.0, %v255_v55  ;;  %v298_v3 = vand.u32 2147483647, %v297_v56  ;;  %v306_v49 = vld [vmem:[%s9701_s16 + $0x10] sm:$0xff] }
  0x60   : > { %v258_v4 = vsub.f32 1.0, %v256_v57  ;;  %v283_v14 = vsub.f32 1.0, %v282_v60  ;;  %v9784_v48 = vand.u32 4294901760, %v307_v39  ;;  %v9802_v53 = vand.u32 4294901760, %v306_v49 }
  0x61   : > { %v237_v5 = vmax.f32 %v235_v58, 0.0  ;;  %v238_v12 = vmax.f32 %v236_v61, 0.0  ;;  %v259_v16 = vmax.f32 %v257_v63, 0.0  ;;  %v299_v18 = vsub.f32 1.0, %v298_v3 }
  0x62   : > { %v260_v19 = vmax.f32 %v258_v4, 0.0  ;;  %v284_v21 = vmax.f32 %v283_v14, 0.0  ;;  %v9812_v56 = vsub.f32 %v307_v39, %v9784_v48 }
  0x63   : > { %v239_v20 = vmul.f32 %v8401_v62, %v237_v5  ;;  %v240_v23 = vmul.f32 %v8401_v62, %v238_v12  ;;  %v261_v24 = vmul.f32 %v8402_v6, %v259_v16  ;;  %v300_v25 = vmax.f32 %v299_v18, 0.0 }
  0x64   : > { %v262_v26 = vmul.f32 %v8402_v6, %v260_v19  ;;  %v285_v27 = vmul.f32 %v8403_v17, %v284_v21  ;;  %v9829_v62 = vsub.f32 %v306_v49, %v9802_v53  ;;  %v907_v3 = vand.u32 4294901760, %v9812_v56 }
  0x65   : > { %v263_v28 = vadd.f32 %v261_v24, %v239_v20  ;;  %v301_v30 = vmul.f32 %v8404_v22, %v300_v25 }
  0x66   : > { %v264_v31 = vadd.f32 %v262_v26, %v240_v23  ;;  %v914_v16 = vand.u32 4294901760, %v9829_v62  ;;  %v908_v18 = vsub.f32 %v9812_v56, %v907_v3  ;;  %v308_v23 = vld [vmem:[%s9701_s16 + $0x20] sm:$0xff] }
  0x67   : > { %v265_v32 = vmul.f32 0.5, %v263_v28  ;;  %v302_v33 = vadd.f32 %v301_v30, %v285_v27  ;;  %v9915_v26 = vand.u32 4294901760, %v308_v23 }
  0x68   : > { %v266_v34 = vmul.f32 0.5, %v264_v31  ;;  %v915_v21 = vsub.f32 %v9829_v62, %v914_v16 }
  0x69   : > { %v9763_v35 = vrot.slane %v265_v32, %v9760_v29  ;;  %v303_v37 = vmul.f32 0.5, %v302_v33  ;;  %v7686_v43 = vcombine.high %v265_v32, %v265_v32  ;;  %v9933_v30 = vsub.f32 %v308_v23, %v9915_v26 }
  0x6a   : > { %v7742_v38 = vrot.slane %v266_v34, %v9760_v29  ;;  %v7735_v45 = vcombine.high %v266_v34, %v266_v34 }
  0x6b   : > { %v7709_v40 = vrot.slane %v9763_v35, %v9760_v29  ;;  %v338_v41 = vsel %vm336_vm13, %v303_v37, 0  ;;  %v9794_v51 = vrot.slane %v7686_v43, %v9760_v29  ;;  %v7701_v20 = vcombine.high %v9763_v35, %v9763_v35 }
  0x6c   : > { %v9773_v42 = vrot.slane %v7742_v38, %v9760_v29  ;;  %v9775_v44 = vand.u32 4294901760, %v338_v41  ;;  %v9805_v54 = vrot.slane %v7735_v45, %v9760_v29  ;;  %v7750_v4 = vcombine.high %v7742_v38, %v7742_v38 }
  0x6d   : > { %v9778_v46 = vrot.slane %v7709_v40, %v9766_v36  ;;  %v7731_v47 = vcombine.high %v7709_v40, %v7709_v40  ;;  %v7702_v57 = vcombine.high %v9794_v51, %v9794_v51  ;;  %v9885_v22 = vrot.slane %v7701_v20, %v9760_v29 }
  0x6e   : > { %v9782_v8 = vrot.slane %v9773_v42, %v9766_v36  ;;  %v9788_v50 = vsub.f32 %v338_v41, %v9775_v44  ;;  %8721 = vmatmul.mubr.f32.vlgmr.msra.gmra.mxu1 %v9775_v44  ;;  %v7751_v59 = vcombine.high %v9805_v54, %v9805_v54  ;;  %v9861_v19 = vrot.slane %v7750_v4, %v9760_v29  ;;  %v311_v41 = vld [vmem:[%s9701_s16 + $0x38] sm:$0xff] }
  0x6f   : > { %7849 = vperm.xlu0 %9445, %v9778_v46   ;;  %8731 = vmatpush3.msra.mxu1 %v9705_v7  ;;  %v9809_v55 = vrot.slane %v7731_v47, %v9766_v36  ;;  %v7730_v60 = vrot.slane %v7702_v57, %v9760_v29  ;;  %v9913_v25 = vrot.slane %v9794_v51, %v9760_v29  ;;  %v1373_v33 = vand.u32 4294901760, %v9933_v30 }
  0x70   : > { %7994 = vperm.xlu1 %9447, %v9782_v8   ;;  %v9797_v52 = vand.u32 4294901760, %v9788_v50  ;;  %8734 = vmatprep.mubr.msk.f32.mxu1 %vm9575_vm0, %v9573_v0  ;;  %v7779_v63 = vrot.slane %v7751_v59, %v9760_v29  ;;  %v7780_v32 = vcombine.high %v9773_v42, %v9773_v42  ;;  %v9976_v39 = vrot.slane %v9805_v54, %v9760_v29  ;;  %v310_v42 = vld [vmem:[%s9701_s16 + $0x30] sm:$0xff] }
  0x71   : > { %8732 = vmatprep.subr.mxu1 %v9573_v0  ;;  %v9836_v5 = vrot.slane %v7730_v60, %v9766_v36  ;;  %v7734_v6 = vcombine.high %v7730_v60, %v7730_v60  ;;  %v9930_v28 = vrot.slane %v9913_v25, %v9766_v36  ;;  %v1374_v37 = vsub.f32 %v9933_v30, %v1373_v33 }
  0x72   : > { %v410_v58 = vsub.f32 %v9788_v50, %v9797_v52  ;;  %8733 = vmatpush3.msra.mxu1 %v9710_v9  ;;  %v9841_v14 = vrot.slane %v7779_v63, %v9766_v36  ;;  %v7783_v12 = vcombine.high %v7779_v63, %v7779_v63  ;;  %v9961_v35 = vrot.slane %v7780_v32, %v9766_v36  ;;  %v313_v63 = vld [vmem:[%s9701_s16 + $0x48] sm:$0xff] }
  0x73   : > { %7881 = vperm.xlu0 %9445, %v9782_v8   ;;  %8735 = vmatmul.mubr.f32.vlgmr.msra.gmra.mxu1 %v9797_v52  ;;  %v1375_v40 = vand.u32 4294901760, %v1374_v37  ;;  %v9988_v29 = vrot.slane %v9976_v39, %v9766_v36  ;;  %v9995_v43 = vand.u32 4294901760, %v311_v41  ;;  %v10002_v45 = vand.u32 4294901760, %v310_v42 }
  0x74   : > { %v9824_v61 = vand.u32 4294901760, %v410_v58  ;;  %8744 = vmatprep.subr.mxu1 %v9573_v0  ;;  %9449 = vset.pattern.permute.xlu1 %v9574_v1  ;;  %v9853_v17 = vrot.slane %v7783_v12, %v9766_v36  ;;  %v7733_v49 = vcombine.high %v9885_v22, %v9885_v22  ;;  %v7732_v57 = vcombine.high %v9913_v25, %v9913_v25 }
  0x75   : > { %8745 = vmatpush3.msra.mxu1 %v9705_v7  ;;  %7857 = vperm.xlu1 %9449, %v9809_v55   ;;  %v9847_v7 = vrot.slane %v7734_v6, %v9766_v36  ;;  %v10009_v47 = vsub.f32 %v311_v41, %v9995_v43  ;;  %v10074_v4 = vand.u32 4294901760, %v313_v63  ;;  %v312_v6 = vld [vmem:[%s9701_s16 + $0x40] sm:$0xff] }
  0x76   : > { %8714 = vmatmul.mubr.f32.vlgmr.msra.gmra.mxu0 %v9824_v61  ;;  %8746 = vmatprep.subr.mxu1 %v9573_v0  ;;  %v10038_v54 = vrot.slane %v7733_v49, %v9766_v36  ;;  %v10060_v60 = vrot.slane %v7732_v57, %v9766_v36  ;;  %v11230_v49 = vmov 2   ;;  %v319_v57 = vld [vmem:[%s9701_s16 + $0x78] sm:$0xff] }
  0x77   : > { %8724 = vmatpush3.msra.mxu0 %v9716_v10  ;;  %8727 = vmatprep.mubr.msk.f32.mxu0 %vm9575_vm0, %v9573_v0  ;;  %v909_v10 = vand.u32 4294901760, %v908_v18  ;;  %v1825_v51 = vand.u32 4294901760, %v10009_v47  ;;  %v10089_v18 = vand.u32 4294901760, %v312_v6  ;;  %v10094_v20 = vsub.f32 %v313_v63, %v10074_v4 }
  0x78   : > { %8725 = vmatprep.subr.mxu0 %v9573_v0  ;;  %9446 = vset.pattern.permute.xlu0 %v9576_v2 }
  0x79   : > { %8726 = vmatpush3.msra.mxu0 %v9719_v11  ;;  %7962 = vperm.xlu0 %9446, %v9778_v46   ;;  %v309_v11 = vld [vmem:[%s9701_s16 + $0x28] sm:$0xff] }
  0x7a   : > { %8737 = vmatprep.subr.mxu0 %v9573_v0  ;;  %8728 = vmatmul.mubr.f32.vlgmr.msra.gmra.mxu0 %v9788_v50  ;;  %v9905_v24 = vand.u32 4294901760, %v309_v11 }
  0x7b   : > { %8738 = vmatpush3.msra.mxu0 %v448_v13  ;;  %8741 = vmatprep.mubr.msk.f32.mxu0 %vm9575_vm0, %v9573_v0  ;;  %v9882_v13 = vrot.slane %v9861_v19, %v9766_v36 }
  0x7c   : > { %8739 = vmatprep.subr.mxu0 %v9573_v0  ;;  %8747 = vmatpush3.msra.mxu1 %v9710_v9  ;;  %v916_v9 = vand.u32 4294901760, %v915_v21  ;;  %v9922_v27 = vsub.f32 %v309_v11, %v9905_v24  ;;  %v10106_v21 = vsub.f32 %v312_v6, %v10089_v18 }
  0x7d   : > { %8740 = vmatpush3.msra.mxu0 %v455_v15  ;;  %8748 = vmatprep.mubr.msk.f32.mxu1 %vm9575_vm0, %v9573_v0  ;;  %v9897_v15 = vrot.slane %v9885_v22, %v9766_v36 }
  0x7e   : > { %8751 = vmatprep.subr.mxu0 %v9573_v0  ;;  %8742 = vmatmul.mubr.f32.vlgmr.msra.gmra.mxu0 %v9775_v44  ;;  %v1366_v31 = vand.u32 4294901760, %v9922_v27 }
  0x7f   : > { %8749 = vmatmul.mubr.f32.vlgmr.msra.gmra.mxu1 %v9775_v44  ;;  %8752 = vmatpush3.msra.mxu0 %v9784_v48 }
  0x80   : > { %8758 = vmatprep.subr.mxu1 %v9573_v0  ;;  %8753 = vmatprep.subr.mxu0 %v9573_v0  ;;  %v1367_v34 = vsub.f32 %v9922_v27, %v1366_v31 }
  0x81   : > { %8759 = vmatpush3.msra.mxu1 %v909_v10  ;;  %7885 = vperm.xlu1 %9449, %v9882_v13   ;;  %v2284_v10 = vand.u32 4294901760, %v10094_v20 }
  0x82   : > { %8754 = vmatpush3.msra.mxu0 %v9802_v53  ;;  %8760 = vmatprep.subr.mxu1 %v9573_v0  ;;  %v1368_v38 = vand.u32 4294901760, %v1367_v34 }
  0x83   : > { %9448 = vset.pattern.permute.xlu0 %v9574_v1  ;;  %8755 = vmatprep.mubr.msk.f32.mxu0 %vm9575_vm0, %v9573_v0  ;;  %v2285_v22 = vsub.f32 %v10094_v20, %v2284_v10 }
  0x84   : > { %8761 = vmatpush3.msra.mxu1 %v916_v9  ;;  %8762 = vmatprep.mubr.msk.f32.mxu1 %vm9575_vm0, %v9573_v0 }
  0x85   : > { %8765 = vmatprep.subr.mxu0 %v9573_v0  ;;  %7853 = vperm.xlu0 %9448, %v9897_v15   ;;  %v2286_v11 = vand.u32 4294901760, %v2285_v22  ;;  %v320_v22 = vld [vmem:[%s9701_s16 + $0x80] sm:$0xff] }
  0x86   : > { %8756 = vmatmul.mubr.f32.vlgmr.msra.gmra.mxu0 %v9824_v61  ;;  %8763 = vmatmul.mubr.f32.vlgmr.msra.gmra.mxu1 %v9775_v44 }
  0x87   : > { %8766 = vmatpush3.msra.mxu0 %v9812_v56  ;;  %8772 = vmatprep.subr.mxu1 %v9573_v0  ;;  %v1826_v56 = vsub.f32 %v10009_v47, %v1825_v51 }
  0x88   : > { %8767 = vmatprep.subr.mxu0 %v9573_v0  ;;  %8773 = vmatpush3.msra.mxu1 %v9784_v48 }
  0x89   : > { %9450 = vset.pattern.permute.xlu1 %v9576_v2  ;;  %8768 = vmatpush3.msra.mxu0 %v9829_v62  ;;  %v1827_v59 = vand.u32 4294901760, %v1826_v56 }
  0x8a   : > { %8774 = vmatprep.subr.mxu1 %v9573_v0  ;;  %7966 = vperm.xlu1 %9450, %v9897_v15  }
  0x8b   : > { %8769 = vmatprep.mubr.msk.f32.mxu0 %vm9575_vm0, %v9573_v0  ;;  %8775 = vmatpush3.msra.mxu1 %v9802_v53 }
  0x8c   : > { %8776 = vmatprep.mubr.msk.f32.mxu1 %vm9575_vm0, %v9573_v0  ;;  %8779 = vmatprep.subr.mxu0 %v9573_v0 }
  0x8d   : > { %7865 = vperm.xlu0 %9448, %v9930_v28   ;;  %8770 = vmatmul.mubr.f32.vlgmr.msra.gmra.mxu0 %v9788_v50 }
  0x8e   : > { %8777 = vmatmul.mubr.f32.vlgmr.msra.gmra.mxu1 %v9797_v52  ;;  %8780 = vmatpush3.msra.mxu0 %v907_v3  ;;  %v7781_v3 = vcombine.high %v9976_v39, %v9976_v39  ;;  %v317_v39 = vld [vmem:[%s9701_s16 + $0x68] sm:$0xff] }
  0x8f   : > { %8786 = vmatprep.subr.mxu1 %v9573_v0  ;;  %8781 = vmatprep.subr.mxu0 %v9573_v0  ;;  %v10212_v41 = vand.u32 4294901760, %v317_v39 }
  0x90   : > { %8787 = vmatpush3.msra.mxu1 %v9784_v48  ;;  %8782 = vmatpush3.msra.mxu0 %v914_v16  ;;  %v10016_v48 = vsub.f32 %v310_v42, %v10002_v45  ;;  %v10083_v12 = vrot.slane %v7781_v3, %v9766_v36  ;;  %v7782_v16 = vcombine.high %v9861_v19, %v9861_v19 }
  0x91   : > { %8788 = vmatprep.subr.mxu1 %v9573_v0  ;;  %7970 = vperm.xlu1 %9450, %v9809_v55  }
  0x92   : > { %8783 = vmatprep.mubr.msk.f32.mxu0 %vm9575_vm0, %v9573_v0  ;;  %8789 = vmatpush3.msra.mxu1 %v9802_v53  ;;  %v1832_v53 = vand.u32 4294901760, %v10016_v48  ;;  %v10101_v19 = vrot.slane %v7782_v16, %v9766_v36  ;;  %v2291_v36 = vand.u32 4294901760, %v10106_v21 }
  0x93   : > { %8790 = vmatprep.mubr.msk.f32.mxu1 %vm9575_vm0, %v9573_v0  ;;  %8793 = vmatprep.subr.mxu0 %v9573_v0 }
  0x94   : > { %7889 = vperm.xlu0 %9448, %v9961_v35   ;;  %8784 = vmatmul.mubr.f32.vlgmr.msra.gmra.mxu0 %v9775_v44  ;;  %v1833_v58 = vsub.f32 %v10016_v48, %v1832_v53  ;;  %v2292_v9 = vsub.f32 %v10106_v21, %v2291_v36 }
  0x95   : > { %8791 = vmatmul.mubr.f32.vlgmr.msra.gmra.mxu1 %v9775_v44  ;;  %8794 = vmatpush3.msra.mxu0 %v9905_v24 }
  0x96   : > { %8800 = vmatprep.subr.mxu1 %v9573_v0  ;;  %8795 = vmatprep.subr.mxu0 %v9573_v0  ;;  %v1834_v62 = vand.u32 4294901760, %v1833_v58  ;;  %v2293_v23 = vand.u32 4294901760, %v2292_v9  ;;  %v318_v58 = vld [vmem:[%s9701_s16 + $0x70] sm:$0xff] }
  0x97   : > { %8801 = vmatpush3.msra.mxu1 %v1368_v38  ;;  %8796 = vmatpush3.msra.mxu0 %v9915_v26 }
  0x98   : > { %8802 = vmatprep.subr.mxu1 %v9573_v0  ;;  %7978 = vperm.xlu1 %9450, %v9930_v28  }
  0x99   : > { %8797 = vmatprep.mubr.msk.f32.mxu0 %vm9575_vm0, %v9573_v0  ;;  %8803 = vmatpush3.msra.mxu1 %v1375_v40  ;;  %v316_v40 = vld [vmem:[%s9701_s16 + $0x60] sm:$0xff] }
  0x9a   : > { %8804 = vmatprep.mubr.msk.f32.mxu1 %vm9575_vm0, %v9573_v0  ;;  %8807 = vmatprep.subr.mxu0 %v9573_v0  ;;  %v10218_v42 = vand.u32 4294901760, %v316_v40 }
  0x9b   : > { %7897 = vperm.xlu0 %9448, %v9988_v29   ;;  %8798 = vmatmul.mubr.f32.vlgmr.msra.gmra.mxu0 %v9824_v61 }
  0x9c   : > { %8805 = vmatmul.mubr.f32.vlgmr.msra.gmra.mxu1 %v9775_v44  ;;  %8808 = vmatpush3.msra.mxu0 %v9922_v27 }
  0x9d   : > { %8814 = vmatprep.subr.mxu1 %v9573_v0  ;;  %8809 = vmatprep.subr.mxu0 %v9573_v0 }
  0x9e   : > { %8815 = vmatpush3.msra.mxu1 %v9905_v24  ;;  %8810 = vmatpush3.msra.mxu0 %v9933_v30 }
  0x9f   : > { %8816 = vmatprep.subr.mxu1 %v9573_v0  ;;  %8002 = vperm.xlu1 %9450, %v9961_v35  }
  0xa0   : > { %8811 = vmatprep.mubr.msk.f32.mxu0 %vm9575_vm0, %v9573_v0  ;;  %8817 = vmatpush3.msra.mxu1 %v9915_v26 }
  0xa1   : > { %8818 = vmatprep.mubr.msk.f32.mxu1 %vm9575_vm0, %v9573_v0  ;;  %8821 = vmatprep.subr.mxu0 %v9573_v0 }
  0xa2   : > { %9451 = vset.pattern.permute.xlu0 %v9576_v2  ;;  %8812 = vmatmul.mubr.f32.vlgmr.msra.gmra.mxu0 %v9788_v50 }
  0xa3   : > { %8819 = vmatmul.mubr.f32.vlgmr.msra.gmra.mxu1 %v9797_v52  ;;  %8822 = vmatpush3.msra.mxu0 %v1366_v31 }
  0xa4   : > { %8828 = vmatprep.subr.mxu1 %v9573_v0  ;;  %7998 = vperm.xlu0 %9451, %v9882_v13  }
  0xa5   : > { %8823 = vmatprep.subr.mxu0 %v9573_v0  ;;  %8829 = vmatpush3.msra.mxu1 %v9905_v24  ;;  %v315_v24 = vld [vmem:[%s9701_s16 + $0x58] sm:$0xff] }
  0xa6   : > { %8824 = vmatpush3.msra.mxu0 %v1373_v33  ;;  %8830 = vmatprep.subr.mxu1 %v9573_v0  ;;  %v10149_v25 = vand.u32 4294901760, %v315_v24 }
  0xa7   : > { %9452 = vset.pattern.permute.xlu1 %v9574_v1  ;;  %8825 = vmatprep.mubr.msk.f32.mxu0 %vm9575_vm0, %v9573_v0 }
  0xa8   : > { %8831 = vmatpush3.msra.mxu1 %v9915_v26  ;;  %8832 = vmatprep.mubr.msk.f32.mxu1 %vm9575_vm0, %v9573_v0  ;;  %v314_v26 = vld [vmem:[%s9701_s16 + $0x50] sm:$0xff]  ;;  %v10163_v30 = vsub.f32 %v315_v24, %v10149_v25 }
  0xa9   : > { %8835 = vmatprep.subr.mxu0 %v9573_v0  ;;  %7861 = vperm.xlu1 %9452, %v10038_v54   ;;  %v10158_v27 = vand.u32 4294901760, %v314_v26 }
  0xaa   : > { %8826 = vmatmul.mubr.f32.vlgmr.msra.gmra.mxu0 %v9775_v44  ;;  %8833 = vmatmul.mubr.f32.vlgmr.msra.gmra.mxu1 %v9775_v44  ;;  %v2743_v32 = vand.u32 4294901760, %v10163_v30 }
  0xab   : > { %8836 = vmatpush3.msra.mxu0 %v9995_v43  ;;  %8842 = vmatprep.subr.mxu1 %v9573_v0  ;;  %v10172_v31 = vsub.f32 %v314_v26, %v10158_v27 }
  0xac   : > { %9453 = vset.pattern.permute.xlu0 %v9574_v1  ;;  %8837 = vmatprep.subr.mxu0 %v9573_v0  ;;  %v2744_v34 = vsub.f32 %v10163_v30, %v2743_v32 }
  0xad   : > { %8843 = vmatpush3.msra.mxu1 %v1827_v59  ;;  %7873 = vperm.xlu0 %9453, %v10060_v60   ;;  %v2750_v33 = vand.u32 4294901760, %v10172_v31  ;;  %v10275_v59 = vand.u32 4294901760, %v319_v57 }
  0xae   : > { %8838 = vmatpush3.msra.mxu0 %v10002_v45  ;;  %8844 = vmatprep.subr.mxu1 %v9573_v0 }
  0xaf   : > { %8839 = vmatprep.mubr.msk.f32.mxu0 %vm9575_vm0, %v9573_v0  ;;  %8845 = vmatpush3.msra.mxu1 %v1834_v62  ;;  %v2751_v37 = vsub.f32 %v10172_v31, %v2750_v33  ;;  %v10282_v62 = vand.u32 4294901760, %v318_v58  ;;  %v10289_v63 = vsub.f32 %v319_v57, %v10275_v59 }
  0xb0   : > { %8846 = vmatprep.mubr.msk.f32.mxu1 %vm9575_vm0, %v9573_v0  ;;  %8849 = vmatprep.subr.mxu0 %v9573_v0 }
  0xb1   : > { %7869 = vperm.xlu1 %9452, %v9836_v5   ;;  %8840 = vmatmul.mubr.f32.vlgmr.msra.gmra.mxu0 %v9824_v61  ;;  %v2752_v38 = vand.u32 4294901760, %v2751_v37  ;;  %v10296_v3 = vsub.f32 %v318_v58, %v10282_v62 }
  0xb2   : > { %8847 = vmatmul.mubr.f32.vlgmr.msra.gmra.mxu1 %v9775_v44  ;;  %8850 = vmatpush3.msra.mxu0 %v10009_v47 }
  0xb3   : > { %8856 = vmatprep.subr.mxu1 %v9573_v0  ;;  %8851 = vmatprep.subr.mxu0 %v9573_v0  ;;  %v3668_v6 = vand.u32 4294901760, %v10296_v3 }
  0xb4   : > { %8857 = vmatpush3.msra.mxu1 %v9995_v43  ;;  %7905 = vperm.xlu0 %9453, %v10083_v12  }
  0xb5   : > { %8852 = vmatpush3.msra.mxu0 %v10016_v48  ;;  %8858 = vmatprep.subr.mxu1 %v9573_v0 }
  0xb6   : > { %8853 = vmatprep.mubr.msk.f32.mxu0 %vm9575_vm0, %v9573_v0  ;;  %8859 = vmatpush3.msra.mxu1 %v10002_v45 }
  0xb7   : > { %8860 = vmatprep.mubr.msk.f32.mxu1 %vm9575_vm0, %v9573_v0  ;;  %8863 = vmatprep.subr.mxu0 %v9573_v0 }
  0xb8   : > { %7893 = vperm.xlu1 %9452, %v10101_v19   ;;  %8854 = vmatmul.mubr.f32.vlgmr.msra.gmra.mxu0 %v9788_v50 }
  0xb9   : > { %8861 = vmatmul.mubr.f32.vlgmr.msra.gmra.mxu1 %v9797_v52  ;;  %8864 = vmatpush3.msra.mxu0 %v1825_v51 }
  0xba   : > { %8870 = vmatprep.subr.mxu1 %v9573_v0  ;;  %8865 = vmatprep.subr.mxu0 %v9573_v0 }
  0xbb   : > { %8871 = vmatpush3.msra.mxu1 %v9995_v43  ;;  %9454 = vset.pattern.permute.xlu0 %v9576_v2  ;;  %v10225_v43 = vsub.f32 %v317_v39, %v10212_v41 }
  0xbc   : > { %8866 = vmatpush3.msra.mxu0 %v1832_v53  ;;  %8872 = vmatprep.subr.mxu1 %v9573_v0 }
  0xbd   : > { %7974 = vperm.xlu0 %9454, %v10038_v54   ;;  %8867 = vmatprep.mubr.msk.f32.mxu0 %vm9575_vm0, %v9573_v0  ;;  %v3202_v47 = vand.u32 4294901760, %v10225_v43 }
  0xbe   : > { %8873 = vmatpush3.msra.mxu1 %v10002_v45  ;;  %8874 = vmatprep.mubr.msk.f32.mxu1 %vm9575_vm0, %v9573_v0  ;;  %v10232_v45 = vsub.f32 %v316_v40, %v10218_v42 }
  0xbf   : > { %8877 = vmatprep.subr.mxu0 %v9573_v0  ;;  %7901 = vperm.xlu1 %9452, %v9841_v14   ;;  %v3203_v48 = vsub.f32 %v10225_v43, %v3202_v47 }
  0xc0   : > { %8868 = vmatmul.mubr.f32.vlgmr.msra.gmra.mxu0 %v9775_v44  ;;  %8875 = vmatmul.mubr.f32.vlgmr.msra.gmra.mxu1 %v9775_v44 }
  0xc1   : > { %8878 = vmatpush3.msra.mxu0 %v10074_v4  ;;  %8884 = vmatprep.subr.mxu1 %v9573_v0  ;;  %v3204_v53 = vand.u32 4294901760, %v3203_v48 }
  0xc2   : > { %8879 = vmatprep.subr.mxu0 %v9573_v0  ;;  %8885 = vmatpush3.msra.mxu1 %v2286_v11  ;;  %v10341_v11 = vand.u32 4294901760, %v320_v22 }
  0xc3   : > { %8880 = vmatpush3.msra.mxu0 %v10089_v18  ;;  %8886 = vmatprep.subr.mxu1 %v9573_v0 }
  0xc4   : > { %7982 = vperm.xlu0 %9454, %v9836_v5   ;;  %8881 = vmatprep.mubr.msk.f32.mxu0 %vm9575_vm0, %v9573_v0  ;;  %v10357_v24 = vsub.f32 %v320_v22, %v10341_v11 }
  0xc5   : > { %8887 = vmatpush3.msra.mxu1 %v2293_v23  ;;  %8888 = vmatprep.mubr.msk.f32.mxu1 %vm9575_vm0, %v9573_v0 }
  0xc6   : > { %8891 = vmatprep.subr.mxu0 %v9573_v0  ;;  %9455 = vset.pattern.permute.xlu1 %v9576_v2 }
  0xc7   : > { %8882 = vmatmul.mubr.f32.vlgmr.msra.gmra.mxu0 %v9824_v61  ;;  %8889 = vmatmul.mubr.f32.vlgmr.msra.gmra.mxu1 %v9775_v44 }
  0xc8   : > { %8892 = vmatpush3.msra.mxu0 %v10094_v20  ;;  %8898 = vmatprep.subr.mxu1 %v9573_v0  ;;  %v9580_v20 = vmov 3  }
  0xc9   : > { %7986 = vperm.xlu1 %9455, %v10060_v60   ;;  %8893 = vmatprep.subr.mxu0 %v9573_v0 }
  0xca   : > { %8899 = vmatpush3.msra.mxu1 %v10074_v4  ;;  %8894 = vmatpush3.msra.mxu0 %v10106_v21 }
  0xcb   : > { %8900 = vmatprep.subr.mxu1 %v9573_v0  ;;  %7990 = vperm.xlu0 %9454, %v9847_v7  }
  0xcc   : > { %8895 = vmatprep.mubr.msk.f32.mxu0 %vm9575_vm0, %v9573_v0  ;;  %8901 = vmatpush3.msra.mxu1 %v10089_v18 }
  0xcd   : > { %8902 = vmatprep.mubr.msk.f32.mxu1 %vm9575_vm0, %v9573_v0  ;;  %8905 = vmatprep.subr.mxu0 %v9573_v0 }
  0xce   : > { %8896 = vmatmul.mubr.f32.vlgmr.msra.gmra.mxu0 %v9788_v50  ;;  %8903 = vmatmul.mubr.f32.vlgmr.msra.gmra.mxu1 %v9797_v52 }
  0xcf   : > { %8906 = vmatpush3.msra.mxu0 %v2284_v10  ;;  %8912 = vmatprep.subr.mxu1 %v9573_v0  ;;  %v321_v10 = vld [vmem:[%s9701_s16 + $0x88] sm:$0xff] }
  0xd0   : > { %9456 = vset.pattern.permute.xlu1 %v9574_v1  ;;  %8907 = vmatprep.subr.mxu0 %v9573_v0  ;;  %v2745_v1 = vand.u32 4294901760, %v2744_v34  ;;  %v10334_v9 = vand.u32 4294901760, %v321_v10 }
  0xd1   : > { %8913 = vmatpush3.msra.mxu1 %v10074_v4  ;;  %7877 = vperm.xlu1 %9456, %v9847_v7   ;;  %v3661_v4 = vand.u32 4294901760, %v10289_v63 }
  0xd2   : > { %8908 = vmatpush3.msra.mxu0 %v2291_v36  ;;  %8914 = vmatprep.subr.mxu1 %v9573_v0 }
  0xd3   : > { %8006 = vperm.xlu0 %9454, %v10101_v19   ;;  %8909 = vmatprep.mubr.msk.f32.mxu0 %vm9575_vm0, %v9573_v0  ;;  %v3662_v16 = vsub.f32 %v10289_v63, %v3661_v4 }
  0xd4   : > { %8915 = vmatpush3.msra.mxu1 %v10089_v18  ;;  %8916 = vmatprep.mubr.msk.f32.mxu1 %vm9575_vm0, %v9573_v0  ;;  %v3669_v18 = vsub.f32 %v10296_v3, %v3668_v6 }
  0xd5   : > { %8919 = vmatprep.subr.mxu0 %v9573_v0  ;;  %8910 = vmatmul.mubr.f32.vlgmr.msra.gmra.mxu0 %v9775_v44  ;;  %v3663_v21 = vand.u32 4294901760, %v3662_v16 }
  0xd6   : > { %8917 = vmatmul.mubr.f32.vlgmr.msra.gmra.mxu1 %v9775_v44  ;;  %8920 = vmatpush3.msra.mxu0 %v10149_v25  ;;  %v3670_v36 = vand.u32 4294901760, %v3669_v18 }
  0xd7   : > { %8926 = vmatprep.subr.mxu1 %v9573_v0  ;;  %8921 = vmatprep.subr.mxu0 %v9573_v0 }
  0xd8   : > { %8927 = vmatpush3.msra.mxu1 %v2745_v1  ;;  %7909 = vperm.xlu1 %9456, %v9853_v17  }
  0xd9   : > { %8922 = vmatpush3.msra.mxu0 %v10158_v27  ;;  %8928 = vmatprep.subr.mxu1 %v9573_v0 }
  0xda   : > { %8014 = vperm.xlu0 %9454, %v9841_v14   ;;  %8923 = vmatprep.mubr.msk.f32.mxu0 %vm9575_vm0, %v9573_v0 }
  0xdb   : > { %8929 = vmatpush3.msra.mxu1 %v2752_v38  ;;  %8930 = vmatprep.mubr.msk.f32.mxu1 %vm9575_vm0, %v9573_v0  ;;  %v322_v38 = vld [vmem:[%s9701_s16 + $0x90] sm:$0xff] }
  0xdc   : > { %8933 = vmatprep.subr.mxu0 %v9573_v0  ;;  %8924 = vmatmul.mubr.f32.vlgmr.msra.gmra.mxu0 %v9824_v61 }
  0xdd   : > { %8931 = vmatmul.mubr.f32.vlgmr.msra.gmra.mxu1 %v9775_v44  ;;  %8934 = vmatpush3.msra.mxu0 %v10163_v30 }
  0xde   : > { %8940 = vmatprep.subr.mxu1 %v9573_v0  ;;  %8935 = vmatprep.subr.mxu0 %v9573_v0 }
  0xdf   : > { %8941 = vmatpush3.msra.mxu1 %v10149_v25  ;;  %9457 = vset.pattern.permute.xlu1 %v9576_v2  ;;  %v3209_v2 = vand.u32 4294901760, %v10232_v45 }
  0xe0   : > { %8936 = vmatpush3.msra.mxu0 %v10172_v31  ;;  %8942 = vmatprep.subr.mxu1 %v9573_v0 }
  0xe1   : > { %8022 = vperm.xlu0 %9454, %v9853_v17   ;;  %8010 = vperm.xlu1 %9457, %v9988_v29   ;;  %v3210_v51 = vsub.f32 %v10232_v45, %v3209_v2 }
  0xe2   : > { %8937 = vmatprep.mubr.msk.f32.mxu0 %vm9575_vm0, %v9573_v0  ;;  %8943 = vmatpush3.msra.mxu1 %v10158_v27 }
  0xe3   : > { %8944 = vmatprep.mubr.msk.f32.mxu1 %vm9575_vm0, %v9573_v0  ;;  %8947 = vmatprep.subr.mxu0 %v9573_v0  ;;  %v3211_v56 = vand.u32 4294901760, %v3210_v51 }
  0xe4   : > { %8938 = vmatmul.mubr.f32.vlgmr.msra.gmra.mxu0 %v9788_v50  ;;  %8945 = vmatmul.mubr.f32.vlgmr.msra.gmra.mxu1 %v9797_v52 }
  0xe5   : > { %8948 = vmatpush3.msra.mxu0 %v2743_v32  ;;  %8954 = vmatprep.subr.mxu1 %v9573_v0 }
  0xe6   : > { %8949 = vmatprep.subr.mxu0 %v9573_v0  ;;  %8955 = vmatpush3.msra.mxu1 %v10149_v25 }
  0xe7   : > { %8950 = vmatpush3.msra.mxu0 %v2750_v33  ;;  %8956 = vmatprep.subr.mxu1 %v9573_v0  ;;  %v323_v33 = vld [vmem:[%s9701_s16 + $0x98] sm:$0xff] }
  0xe8   : > { %9459 = vset.pattern.permute.xlu0 %v11230_v49  ;;  %8018 = vperm.xlu1 %9457, %v10083_v12   ;;  %v10402_v40 = vand.u32 4294901760, %v323_v33 }
  0xe9   : > { %8951 = vmatprep.mubr.msk.f32.mxu0 %vm9575_vm0, %v9573_v0  ;;  %8957 = vmatpush3.msra.mxu1 %v10158_v27  ;;  %v4127_v27 = vand.u32 4294901760, %v10357_v24 }
  0xea   : > { %8958 = vmatprep.mubr.msk.f32.mxu1 %vm9575_vm0, %v9573_v0  ;;  %8961 = vmatprep.subr.mxu0 %v9573_v0  ;;  %v10350_v23 = vpop.permute.xlu0 %7849 }
  0xeb   : > { %8079 = vperm.xlu0 %9459, %v9897_v15   ;;  %8952 = vmatmul.mubr.f32.vlgmr.msra.gmra.mxu0 %v9775_v44  ;;  %v10368_v26 = vpop.permute.xlu1 %7994  ;;  %v4128_v32 = vsub.f32 %v10357_v24, %v4127_v27 }
  0xec   : > { %8959 = vmatmul.mubr.f32.vlgmr.msra.gmra.mxu1 %v9775_v44  ;;  %8962 = vmatpush3.msra.mxu0 %v10212_v41 }
  0xed   : > { %8968 = vmatprep.subr.mxu1 %v9573_v0  ;;  %8963 = vmatprep.subr.mxu0 %v9573_v0  ;;  %v4129_v39 = vand.u32 4294901760, %v4128_v32 }
  0xee   : > { %8969 = vmatpush3.msra.mxu1 %v3204_v53  ;;  %8964 = vmatpush3.msra.mxu0 %v10218_v42  ;;  %v10373_v30 = vpop.permute.xlu0 %7881 }
  0xef   : > { %8970 = vmatprep.subr.mxu1 %v9573_v0  ;;  %9458 = vset.pattern.permute.xlu1 %v11230_v49 }
  0xf0   : > { %8965 = vmatprep.mubr.msk.f32.mxu0 %vm9575_vm0, %v9573_v0  ;;  %8971 = vmatpush3.msra.mxu1 %v3211_v56  ;;  %v10392_v34 = vpop.permute.xlu1 %7857 }
  0xf1   : > { %8972 = vmatprep.mubr.msk.f32.mxu1 %vm9575_vm0, %v9573_v0  ;;  %8975 = vmatprep.subr.mxu0 %v9573_v0 }
  0xf2   : > { %8091 = vperm.xlu0 %9459, %v9930_v28   ;;  %8075 = vperm.xlu1 %9458, %v9778_v46  }
  0xf3   : > { %8966 = vmatmul.mubr.f32.vlgmr.msra.gmra.mxu0 %v9824_v61  ;;  %8973 = vmatmul.mubr.f32.vlgmr.msra.gmra.mxu1 %v9775_v44 }
  0xf4   : > { %8976 = vmatpush3.msra.mxu0 %v10225_v43  ;;  %8982 = vmatprep.subr.mxu1 %v9573_v0  ;;  %v10395_v1 = vpop.permute.xlu0 %7962 }
  0xf5   : > { %8977 = vmatprep.subr.mxu0 %v9573_v0  ;;  %8983 = vmatpush3.msra.mxu1 %v10212_v41 }
  0xf6   : > { %8978 = vmatpush3.msra.mxu0 %v10232_v45  ;;  %8984 = vmatprep.subr.mxu1 %v9573_v0 }
  0xf7   : > { %8979 = vmatprep.mubr.msk.f32.mxu0 %vm9575_vm0, %v9573_v0  ;;  %8985 = vmatpush3.msra.mxu1 %v10218_v42 }
  0xf8   : > { %8986 = vmatprep.mubr.msk.f32.mxu1 %vm9575_vm0, %v9573_v0  ;;  %8989 = vmatprep.subr.mxu0 %v9573_v0 }
  0xf9   : > { %8099 = vperm.xlu0 %9459, %v10060_v60   ;;  %8083 = vperm.xlu1 %9458, %v9809_v55  }
  0xfa   : > { %8980 = vmatmul.mubr.f32.vlgmr.msra.gmra.mxu0 %v9788_v50  ;;  %8987 = vmatmul.mubr.f32.vlgmr.msra.gmra.mxu1 %v9797_v52 }
  0xfb   : > { %8990 = vmatpush3.msra.mxu0 %v3202_v47  ;;  %8996 = vmatprep.subr.mxu1 %v9573_v0 }
  0xfc   : > { %8991 = vmatprep.subr.mxu0 %v9573_v0  ;;  %8997 = vmatpush3.msra.mxu1 %v10212_v41  ;;  %v10407_v41 = vand.u32 4294901760, %v322_v38 }
  0xfd   : > { %8992 = vmatpush3.msra.mxu0 %v3209_v2  ;;  %8998 = vmatprep.subr.mxu1 %v9573_v0 }
  0xfe   : > { %8993 = vmatprep.mubr.msk.f32.mxu0 %vm9575_vm0, %v9573_v0  ;;  %8999 = vmatpush3.msra.mxu1 %v10218_v42  ;;  %v10412_v42 = vpop.permute.xlu1 %7885  ;;  %v10426_v45 = vsub.f32 %v322_v38, %v10407_v41 }
  0xff   : > { %9000 = vmatprep.mubr.msk.f32.mxu1 %vm9575_vm0, %v9573_v0  ;;  %9003 = vmatprep.subr.mxu0 %v9573_v0 }
 0x100   : > { %9460 = vset.pattern.permute.xlu0 %v9580_v20  ;;  %8087 = vperm.xlu1 %9458, %v10038_v54   ;;  %v10419_v43 = vpop.permute.xlu0 %7853  ;;  %v4586_v48 = vand.u32 4294901760, %v10426_v45 }
 0x101   : > { %8994 = vmatmul.mubr.f32.vlgmr.msra.gmra.mxu0 %v9775_v44  ;;  %9001 = vmatmul.mubr.f32.vlgmr.msra.gmra.mxu1 %v9775_v44 }
 0x102   : > { %9004 = vmatpush3.msra.mxu0 %v10275_v59  ;;  %9010 = vmatprep.subr.mxu1 %v9573_v0  ;;  %v4587_v56 = vsub.f32 %v10426_v45, %v4586_v48 }
 0x103   : > { %8188 = vperm.xlu0 %9460, %v9778_v46   ;;  %9005 = vmatprep.subr.mxu0 %v9573_v0  ;;  %v10348_v46 = vsub.f32 %v321_v10, %v10334_v9 }
 0x104   : > { %9011 = vmatpush3.msra.mxu1 %v3663_v21  ;;  %9006 = vmatpush3.msra.mxu0 %v10282_v62 }
 0x105   : > { %9012 = vmatprep.subr.mxu1 %v9573_v0  ;;  %9007 = vmatprep.mubr.msk.f32.mxu0 %vm9575_vm0, %v9573_v0  ;;  %v4120_v25 = vand.u32 4294901760, %v10348_v46  ;;  %v10436_v2 = vpop.permute.xlu1 %7966 }
 0x106   : > { %9013 = vmatpush3.msra.mxu1 %v3670_v36  ;;  %9014 = vmatprep.mubr.msk.f32.mxu1 %vm9575_vm0, %v9573_v0 }
 0x107   : > { %9017 = vmatprep.subr.mxu0 %v9573_v0  ;;  %8095 = vperm.xlu1 %9458, %v9836_v5   ;;  %v4121_v31 = vsub.f32 %v10348_v46, %v4120_v25 }
 0x108   : > { %9008 = vmatmul.mubr.f32.vlgmr.msra.gmra.mxu0 %v9824_v61  ;;  %9015 = vmatmul.mubr.f32.vlgmr.msra.gmra.mxu1 %v9775_v44  ;;  %v10442_v51 = vpop.permute.xlu0 %7865 }
 0x109   : > { %9018 = vmatpush3.msra.mxu0 %v10289_v63  ;;  %9024 = vmatprep.subr.mxu1 %v9573_v0  ;;  %v4122_v37 = vand.u32 4294901760, %v4121_v31  ;;  %v4588_v63 = vand.u32 4294901760, %v4587_v56 }
 0x10a   : > { %9019 = vmatprep.subr.mxu0 %v9573_v0  ;;  %9025 = vmatpush3.msra.mxu1 %v10275_v59 }
 0x10b   : > { %9020 = vmatpush3.msra.mxu0 %v10296_v3  ;;  %9026 = vmatprep.subr.mxu1 %v9573_v0  ;;  %v324_v3 = vld [vmem:[%s9701_s16 + $0xa0] sm:$0xff] }
 0x10c   : > { %9021 = vmatprep.mubr.msk.f32.mxu0 %vm9575_vm0, %v9573_v0  ;;  %9027 = vmatpush3.msra.mxu1 %v10282_v62  ;;  %v10463_v57 = vpop.permute.xlu1 %7970 }
 0x10d   : > { %9028 = vmatprep.mubr.msk.f32.mxu1 %vm9575_vm0, %v9573_v0  ;;  %9031 = vmatprep.subr.mxu0 %v9573_v0 }
 0x10e   : > { %8103 = vperm.xlu1 %9458, %v9847_v7   ;;  %9022 = vmatmul.mubr.f32.vlgmr.msra.gmra.mxu0 %v9788_v50 }
 0x10f   : > { %9029 = vmatmul.mubr.f32.vlgmr.msra.gmra.mxu1 %v9797_v52  ;;  %9032 = vmatpush3.msra.mxu0 %v3661_v4 }
 0x110   : > { %9038 = vmatprep.subr.mxu1 %v9573_v0  ;;  %9033 = vmatprep.subr.mxu0 %v9573_v0 }
 0x111   : > { %9039 = vmatpush3.msra.mxu1 %v10275_v59  ;;  %9034 = vmatpush3.msra.mxu0 %v3668_v6  ;;  %v325_v59 = vld [vmem:[%s9701_s16 + $0xa8] sm:$0xff]  ;;  %v10483_v6 = vand.u32 4294901760, %v324_v3 }
 0x112   : > { %9040 = vmatprep.subr.mxu1 %v9573_v0  ;;  %9035 = vmatprep.mubr.msk.f32.mxu0 %vm9575_vm0, %v9573_v0  ;;  %v10478_v4 = vand.u32 4294901760, %v325_v59 }
 0x113   : > { %9041 = vmatpush3.msra.mxu1 %v10282_v62  ;;  %9042 = vmatprep.mubr.msk.f32.mxu1 %vm9575_vm0, %v9573_v0  ;;  %v10469_v62 = vpop.permute.xlu0 %7889  ;;  %v10485_v16 = vpop.permute.xlu1 %7978  ;;  %v10502_v21 = vsub.f32 %v324_v3, %v10483_v6 }
 0x114   : > { %9045 = vmatprep.subr.mxu0 %v9573_v0  ;;  %9461 = vset.pattern.permute.xlu1 %v9580_v20 }
 0x115   : > { %9036 = vmatmul.mubr.f32.vlgmr.msra.gmra.mxu0 %v9775_v44  ;;  %9043 = vmatmul.mubr.f32.vlgmr.msra.gmra.mxu1 %v9775_v44 }
 0x116   : > { %9046 = vmatpush3.msra.mxu0 %v10334_v9  ;;  %9052 = vmatprep.subr.mxu1 %v9573_v0 }
 0x117   : > { %8192 = vperm.xlu1 %9461, %v9897_v15   ;;  %9047 = vmatprep.subr.mxu0 %v9573_v0  ;;  %v10417_v15 = vsub.f32 %v323_v33, %v10402_v40  ;;  %v10489_v18 = vpop.permute.xlu0 %7897 }
 0x118   : > { %9053 = vmatpush3.msra.mxu1 %v4122_v37  ;;  %9048 = vmatpush3.msra.mxu0 %v10341_v11  ;;  %v327_v37 = vld [vmem:[%s9701_s16 + $0xb8] sm:$0xff] }
 0x119   : > { %9054 = vmatprep.subr.mxu1 %v9573_v0  ;;  %9049 = vmatprep.mubr.msk.f32.mxu0 %vm9575_vm0, %v9573_v0  ;;  %v4579_v47 = vand.u32 4294901760, %v10417_v15 }
 0x11a   : > { %9055 = vmatpush3.msra.mxu1 %v4129_v39  ;;  %9056 = vmatprep.mubr.msk.f32.mxu1 %vm9575_vm0, %v9573_v0  ;;  %v10509_v22 = vpop.permute.xlu1 %8002 }
 0x11b   : > { %9059 = vmatprep.subr.mxu0 %v9573_v0  ;;  %9050 = vmatmul.mubr.f32.vlgmr.msra.gmra.mxu0 %v9824_v61  ;;  %v4580_v53 = vsub.f32 %v10417_v15, %v4579_v47 }
 0x11c   : > { %9057 = vmatmul.mubr.f32.vlgmr.msra.gmra.mxu1 %v9775_v44  ;;  %9060 = vmatpush3.msra.mxu0 %v10348_v46 }
 0x11d   : > { %9066 = vmatprep.subr.mxu1 %v9573_v0  ;;  %9061 = vmatprep.subr.mxu0 %v9573_v0  ;;  %v4581_v58 = vand.u32 4294901760, %v4580_v53 }
 0x11e   : > { %9067 = vmatpush3.msra.mxu1 %v10334_v9  ;;  %9062 = vmatpush3.msra.mxu0 %v10357_v24 }
 0x11f   : > { %9068 = vmatprep.subr.mxu1 %v9573_v0  ;;  %9063 = vmatprep.mubr.msk.f32.mxu0 %vm9575_vm0, %v9573_v0 }
 0x120   : > { %9069 = vmatpush3.msra.mxu1 %v10341_v11  ;;  %9070 = vmatprep.mubr.msk.f32.mxu1 %vm9575_vm0, %v9573_v0 }
 0x121   : > { %9073 = vmatprep.subr.mxu0 %v9573_v0  ;;  %9064 = vmatmul.mubr.f32.vlgmr.msra.gmra.mxu0 %v9788_v50 }
 0x122   : > { %9071 = vmatmul.mubr.f32.vlgmr.msra.gmra.mxu1 %v9797_v52  ;;  %9074 = vmatpush3.msra.mxu0 %v4120_v25 }
 0x123   : > { %9080 = vmatprep.subr.mxu1 %v9573_v0  ;;  %9075 = vmatprep.subr.mxu0 %v9573_v0 }
 0x124   : > { %9081 = vmatpush3.msra.mxu1 %v10334_v9  ;;  %9076 = vmatpush3.msra.mxu0 %v4127_v27  ;;  %v10514_v9 = vpop.permute.xlu0 %7998  ;;  %v10536_v32 = vpop.permute.xlu1 %7861 }
 0x125   : > { %9082 = vmatprep.subr.mxu1 %v9573_v0  ;;  %9077 = vmatprep.mubr.msk.f32.mxu0 %vm9575_vm0, %v9573_v0 }
 0x126   : > { %9083 = vmatpush3.msra.mxu1 %v10341_v11  ;;  %9084 = vmatprep.mubr.msk.f32.mxu1 %vm9575_vm0, %v9573_v0  ;;  %v5045_v11 = vand.u32 4294901760, %v10502_v21 }
 0x127   : > { %9087 = vmatprep.subr.mxu0 %v9573_v0  ;;  %9078 = vmatmul.mubr.f32.vlgmr.msra.gmra.mxu0 %v9775_v44 }
 0x128   : > { %9085 = vmatmul.mubr.f32.vlgmr.msra.gmra.mxu1 %v9775_v44  ;;  %9088 = vmatpush3.msra.mxu0 %v10402_v40  ;;  %v5046_v31 = vsub.f32 %v10502_v21, %v5045_v11  ;;  %v10542_v38 = vpop.permute.xlu0 %7873 }
 0x129   : > { %9094 = vmatprep.subr.mxu1 %v9573_v0  ;;  %8196 = vperm.xlu1 %9461, %v9809_v55   ;;  %v10495_v55 = vsub.f32 %v325_v59, %v10478_v4 }
 0x12a   : > { %9089 = vmatprep.subr.mxu0 %v9573_v0  ;;  %9095 = vmatpush3.msra.mxu1 %v4581_v58 }
 0x12b   : > { %9090 = vmatpush3.msra.mxu0 %v10407_v41  ;;  %9096 = vmatprep.subr.mxu1 %v9573_v0  ;;  %v5038_v36 = vand.u32 4294901760, %v10495_v55 }
 0x12c   : > { %9091 = vmatprep.mubr.msk.f32.mxu0 %vm9575_vm0, %v9573_v0  ;;  %9097 = vmatpush3.msra.mxu1 %v4588_v63  ;;  %v10559_v58 = vpop.permute.xlu1 %7869 }
 0x12d   : > { %9098 = vmatprep.mubr.msk.f32.mxu1 %vm9575_vm0, %v9573_v0  ;;  %9101 = vmatprep.subr.mxu0 %v9573_v0  ;;  %v5039_v24 = vsub.f32 %v10495_v55, %v5038_v36 }
 0x12e   : > { %9092 = vmatmul.mubr.f32.vlgmr.msra.gmra.mxu0 %v9824_v61  ;;  %9099 = vmatmul.mubr.f32.vlgmr.msra.gmra.mxu1 %v9775_v44  ;;  %v494_v20 = vpop.f32.mrf.mxu1 }
 0x12f   : > { %9102 = vmatpush3.msra.mxu0 %v10417_v15  ;;  %9108 = vmatprep.subr.mxu1 %v9573_v0  ;;  %v326_v15 = vld [vmem:[%s9701_s16 + $0xb0] sm:$0xff]  ;;  %v10564_v63 = vpop.permute.xlu0 %7905 }
 0x130   : > { %9103 = vmatprep.subr.mxu0 %v9573_v0  ;;  %9109 = vmatpush3.msra.mxu1 %v10402_v40  ;;  %v8722_v10 = vpop.f32.mrf.mxu1  ;;  %v10557_v56 = vand.u32 4294901760, %v326_v15  ;;  %11237 = vst [vmem:[#allocation13_spill] sm:$0xff] %v10564_v63 }
 0x131   : > { %9104 = vmatpush3.msra.mxu0 %v10426_v45  ;;  %9110 = vmatprep.subr.mxu1 %v9573_v0 }
 0x132   : > { %9105 = vmatprep.mubr.msk.f32.mxu0 %vm9575_vm0, %v9573_v0  ;;  %9111 = vmatpush3.msra.mxu1 %v10407_v41 }
 0x133   : > { %9112 = vmatprep.mubr.msk.f32.mxu1 %vm9575_vm0, %v9573_v0  ;;  %9115 = vmatprep.subr.mxu0 %v9573_v0  ;;  %v645_v46 = vpop.f32.mrf.mxu1 }
 0x134   : > { %9106 = vmatmul.mubr.f32.vlgmr.msra.gmra.mxu0 %v9788_v50  ;;  %9113 = vmatmul.mubr.f32.vlgmr.msra.gmra.mxu1 %v9797_v52 }
 0x135   : > { %9116 = vmatpush3.msra.mxu0 %v4579_v47  ;;  %9122 = vmatprep.subr.mxu1 %v9573_v0  ;;  %v8736_v25 = vpop.f32.mrf.mxu1  ;;  %v10552_v47 = vand.u32 4294901760, %v327_v37 }
 0x136   : > { %9117 = vmatprep.subr.mxu0 %v9573_v0  ;;  %9123 = vmatpush3.msra.mxu1 %v10402_v40  ;;  %v413_v27 = vpop.f32.mrf.mxu0  ;;  %v5040_v40 = vand.u32 4294901760, %v5039_v24  ;;  %v10576_v24 = vsub.f32 %v326_v15, %v10557_v56 }
 0x137   : > { %9118 = vmatpush3.msra.mxu0 %v4586_v48  ;;  %9124 = vmatprep.subr.mxu1 %v9573_v0  ;;  %v495_v33 = vadd.f32 %v494_v20, %v413_v27 }
 0x138   : > { %9119 = vmatprep.mubr.msk.f32.mxu0 %vm9575_vm0, %v9573_v0  ;;  %9125 = vmatpush3.msra.mxu1 %v10407_v41  ;;  %v8715_v39 = vpop.f32.mrf.mxu0  ;;  %v5047_v41 = vand.u32 4294901760, %v5046_v31 }
 0x139   : > { %9126 = vmatprep.mubr.msk.f32.mxu1 %vm9575_vm0, %v9573_v0  ;;  %9129 = vmatprep.subr.mxu0 %v9573_v0  ;;  %v5504_v39 = vand.u32 4294901760, %v10576_v24 }
 0x13a   : > { %9120 = vmatmul.mubr.f32.vlgmr.msra.gmra.mxu0 %v9775_v44  ;;  %9127 = vmatmul.mubr.f32.vlgmr.msra.gmra.mxu1 %v9775_v44  ;;  %v570_v45 = vpop.f32.mrf.mxu0 }
 0x13b   : > { %9130 = vmatpush3.msra.mxu0 %v10478_v4  ;;  %9136 = vmatprep.subr.mxu1 %v9573_v0  ;;  %v571_v48 = vadd.f32 %v570_v45, %v495_v33  ;;  %v10585_v33 = vpop.permute.xlu1 %7893 }
 0x13c   : > { %8200 = vperm.xlu0 %9460, %v10038_v54   ;;  %9131 = vmatprep.subr.mxu0 %v9573_v0  ;;  %v8729_v53 = vpop.f32.mrf.mxu0  ;;  %v10569_v54 = vsub.f32 %v327_v37, %v10552_v47  ;;  %v10590_v37 = vpop.permute.xlu0 %7974 }
 0x13d   : > { %9137 = vmatpush3.msra.mxu1 %v5040_v40  ;;  %9132 = vmatpush3.msra.mxu0 %v10483_v6  ;;  %v646_v59 = vadd.f32 %v645_v46, %v571_v48 }
 0x13e   : > { %9138 = vmatprep.subr.mxu1 %v9573_v0  ;;  %9133 = vmatprep.mubr.msk.f32.mxu0 %vm9575_vm0, %v9573_v0  ;;  %v722_v3 = vpop.f32.mrf.mxu0  ;;  %v5497_v31 = vand.u32 4294901760, %v10569_v54 }
 0x13f   : > { %9139 = vmatpush3.msra.mxu1 %v5047_v41  ;;  %9140 = vmatprep.mubr.msk.f32.mxu1 %vm9575_vm0, %v9573_v0  ;;  %v723_v20 = vadd.f32 %v722_v3, %v646_v59  ;;  %v795_v10 = vpop.f32.mrf.mxu1  ;;  %v328_v3 = vld [vmem:[%s9701_s16 + $0xc0] sm:$0xff] }
 0x140   : > { %9143 = vmatprep.subr.mxu0 %v9573_v0  ;;  %9134 = vmatmul.mubr.f32.vlgmr.msra.gmra.mxu0 %v9824_v61  ;;  %v8743_v46 = vpop.f32.mrf.mxu0  ;;  %v5498_v15 = vsub.f32 %v10569_v54, %v5497_v31  ;;  %v10617_v59 = vpop.permute.xlu0 %7982 }
 0x141   : > { %9141 = vmatmul.mubr.f32.vlgmr.msra.gmra.mxu1 %v9775_v44  ;;  %9144 = vmatpush3.msra.mxu0 %v10495_v55  ;;  %v10578_v25 = vadd.f32 %v795_v10, %v723_v20  ;;  %v8750_v27 = vpop.f32.mrf.mxu1  ;;  %v5505_v55 = vsub.f32 %v10576_v24, %v5504_v39 }
 0x142   : > { %9150 = vmatprep.subr.mxu1 %v9573_v0  ;;  %9145 = vmatprep.subr.mxu0 %v9573_v0 }
 0x143   : > { %9151 = vmatpush3.msra.mxu1 %v10478_v4  ;;  %9146 = vmatpush3.msra.mxu0 %v10502_v21  ;;  %v329_v21 = vld [vmem:[%s9701_s16 + $0xc8] sm:$0xff] }
 0x144   : > { %9152 = vmatprep.subr.mxu1 %v9573_v0  ;;  %9147 = vmatprep.mubr.msk.f32.mxu0 %vm9575_vm0, %v9573_v0 }
 0x145   : > { %9153 = vmatpush3.msra.mxu1 %v10483_v6  ;;  %9154 = vmatprep.mubr.msk.f32.mxu1 %vm9575_vm0, %v9573_v0 }
 0x146   : > { %9157 = vmatprep.subr.mxu0 %v9573_v0  ;;  %9148 = vmatmul.mubr.f32.vlgmr.msra.gmra.mxu0 %v9788_v50  ;;  %v872_v40 = vpop.f32.mrf.mxu0  ;;  %v953_v45 = vpop.f32.mrf.mxu1 }
 0x147   : > { %9155 = vmatmul.mubr.f32.vlgmr.msra.gmra.mxu1 %v9797_v52  ;;  %9158 = vmatpush3.msra.mxu0 %v5038_v36  ;;  %v954_v41 = vadd.f32 %v953_v45, %v872_v40  ;;  %v10612_v36 = vpop.permute.xlu1 %7901  ;;  %v10639_v45 = vpop.permute.xlu0 %7990 }
 0x148   : > { %9164 = vmatprep.subr.mxu1 %v9573_v0  ;;  %9159 = vmatprep.subr.mxu0 %v9573_v0  ;;  %v8757_v48 = vpop.f32.mrf.mxu0  ;;  %11238 = vst [vmem:[#allocation14_spill] sm:$0xff] %v10612_v36  ;;  %v8764_v53 = vpop.f32.mrf.mxu1 }
 0x149   : > { %9165 = vmatpush3.msra.mxu1 %v10478_v4  ;;  %9160 = vmatpush3.msra.mxu0 %v5045_v11  ;;  %v5499_v4 = vand.u32 4294901760, %v5498_v15  ;;  %v5506_v11 = vand.u32 4294901760, %v5505_v55  ;;  %v10637_v15 = vand.u32 4294901760, %v328_v3 }
 0x14a   : > { %9166 = vmatprep.subr.mxu1 %v9573_v0  ;;  %9161 = vmatprep.mubr.msk.f32.mxu0 %vm9575_vm0, %v9573_v0 }
 0x14b   : > { %9167 = vmatpush3.msra.mxu1 %v10483_v6  ;;  %9168 = vmatprep.mubr.msk.f32.mxu1 %vm9575_vm0, %v9573_v0  ;;  %v10630_v6 = vand.u32 4294901760, %v329_v21  ;;  %v10633_v27 = vpop.permute.xlu1 %7986  ;;  %v10654_v55 = vsub.f32 %v328_v3, %v10637_v15  ;;  %v7912_v3 = vmul.f32 %v10350_v23, %v10578_v25 }
 0x14c   : > { %9171 = vmatprep.subr.mxu0 %v9573_v0  ;;  %9162 = vmatmul.mubr.f32.vlgmr.msra.gmra.mxu0 %v9775_v44 }
 0x14d   : > { %9169 = vmatmul.mubr.f32.vlgmr.msra.gmra.mxu1 %v9775_v44  ;;  %9172 = vmatpush3.msra.mxu0 %v10552_v47  ;;  %v1029_v20 = vpop.f32.mrf.mxu0 }
 0x14e   : > { %9178 = vmatprep.subr.mxu1 %v9573_v0  ;;  %8204 = vperm.xlu1 %9461, %v9930_v28   ;;  %v1030_v10 = vadd.f32 %v1029_v20, %v954_v41  ;;  %v1104_v46 = vpop.f32.mrf.mxu1  ;;  %v10647_v41 = vsub.f32 %v329_v21, %v10630_v6 }
 0x14f   : > { %9173 = vmatprep.subr.mxu0 %v9573_v0  ;;  %9179 = vmatpush3.msra.mxu1 %v5499_v4  ;;  %v8771_v40 = vpop.f32.mrf.mxu0  ;;  %v10658_v4 = vpop.permute.xlu1 %7877 }
 0x150   : > { %9174 = vmatpush3.msra.mxu0 %v10557_v56  ;;  %9180 = vmatprep.subr.mxu1 %v9573_v0  ;;  %v1105_v48 = vadd.f32 %v1104_v46, %v1030_v10  ;;  %v8778_v28 = vpop.f32.mrf.mxu1  ;;  %v5956_v20 = vand.u32 4294901760, %v10647_v41  ;;  %v10663_v10 = vpop.permute.xlu0 %8006  ;;  %v8025_v40 = vmul.f32 %v10395_v1, %v10578_v25 }
 0x151   : > { %9175 = vmatprep.mubr.msk.f32.mxu0 %vm9575_vm0, %v9573_v0  ;;  %9181 = vmatpush3.msra.mxu1 %v5506_v11 }
 0x152   : > { %9182 = vmatprep.mubr.msk.f32.mxu1 %vm9575_vm0, %v9573_v0  ;;  %9185 = vmatprep.subr.mxu0 %v9573_v0 }
 0x153   : > { %9176 = vmatmul.mubr.f32.vlgmr.msra.gmra.mxu0 %v9824_v61  ;;  %9183 = vmatmul.mubr.f32.vlgmr.msra.gmra.mxu1 %v9775_v44 }
 0x154   : > { %9186 = vmatpush3.msra.mxu0 %v10569_v54  ;;  %9192 = vmatprep.subr.mxu1 %v9573_v0  ;;  %v1181_v53 = vpop.f32.mrf.mxu0 }
 0x155   : > { %9187 = vmatprep.subr.mxu0 %v9573_v0  ;;  %9193 = vmatpush3.msra.mxu1 %v10552_v47  ;;  %v1182_v21 = vadd.f32 %v1181_v53, %v1105_v48  ;;  %v1254_v11 = vpop.f32.mrf.mxu1  ;;  %v11231_v53 = vand.u32 4294901760, %v10654_v55 }
 0x156   : > { %9188 = vmatpush3.msra.mxu0 %v10576_v24  ;;  %9194 = vmatprep.subr.mxu1 %v9573_v0  ;;  %v8785_v46 = vpop.f32.mrf.mxu0  ;;  %v331_v24 = vld [vmem:[%s9701_s16 + $0xd8] sm:$0xff] }
 0x157   : > { %9189 = vmatprep.mubr.msk.f32.mxu0 %vm9575_vm0, %v9573_v0  ;;  %9195 = vmatpush3.msra.mxu1 %v10557_v56  ;;  %v10672_v48 = vadd.f32 %v1254_v11, %v1182_v21  ;;  %v8792_v28 = vpop.f32.mrf.mxu1  ;;  %v5957_v21 = vsub.f32 %v10647_v41, %v5956_v20  ;;  %v10692_v11 = vpop.permute.xlu1 %7909 }
 0x158   : > { %9196 = vmatprep.mubr.msk.f32.mxu1 %vm9575_vm0, %v9573_v0  ;;  %9199 = vmatprep.subr.mxu0 %v9573_v0  ;;  %11239 = vst [vmem:[#allocation15_spill] sm:$0xff] %v10692_v11  ;;  %v10704_v28 = vpop.permute.xlu0 %8014 }
 0x159   : > { %9190 = vmatmul.mubr.f32.vlgmr.msra.gmra.mxu0 %v9788_v50  ;;  %9197 = vmatmul.mubr.f32.vlgmr.msra.gmra.mxu1 %v9797_v52  ;;  %v7913_v23 = vmul.f32 %v10419_v43, %v10672_v48  ;;  %v8026_v1 = vmul.f32 %v10436_v2, %v10672_v48  ;;  %v7929_v43 = vsel %vm7928_vm14, %v7912_v3, 0.0  ;;  %v8041_v2 = vsel %vm7928_vm14, %v8025_v40, 0.0 }
 0x15a   : > { %9200 = vmatpush3.msra.mxu0 %v5497_v31  ;;  %9206 = vmatprep.subr.mxu1 %v9573_v0 }
 0x15b   : > { %9201 = vmatprep.subr.mxu0 %v9573_v0  ;;  %9207 = vmatpush3.msra.mxu1 %v10552_v47  ;;  %v7930_v54 = vsel %vm7928_vm14, %v7913_v23, 0.0  ;;  %v8042_v31 = vsel %vm7928_vm14, %v8026_v1, 0.0  ;;  %v1331_v46 = vpop.f32.mrf.mxu0  ;;  %v5964_v47 = vsub.f32 %v10654_v55, %v11231_v53  ;;  %v5958_v1 = vand.u32 4294901760, %v5957_v21 }
 0x15c   : > { %9202 = vmatpush3.msra.mxu0 %v5504_v39  ;;  %9208 = vmatprep.subr.mxu1 %v9573_v0  ;;  %v10706_v3 = vadd.f32 %v7930_v54, %v7929_v43  ;;  %v10708_v40 = vadd.f32 %v8042_v31, %v8041_v2  ;;  %v1412_v39 = vpop.f32.mrf.mxu1  ;;  %v330_v43 = vld [vmem:[%s9701_s16 + $0xd0] sm:$0xff]  ;;  %v10722_v54 = vand.u32 4294901760, %v331_v24  ;;  %v10726_v31 = vpop.permute.xlu1 %8010 }
 0x15d   : > { %9203 = vmatprep.mubr.msk.f32.mxu0 %vm9575_vm0, %v9573_v0  ;;  %9209 = vmatpush3.msra.mxu1 %v10557_v56  ;;  %v8799_v23 = vpop.f32.mrf.mxu0  ;;  %v1413_v49 = vadd.f32 %v1412_v39, %v1331_v46  ;;  %v5965_v56 = vand.u32 4294901760, %v5964_v47  ;;  %v10729_v21 = vand.u32 4294901760, %v330_v43  ;;  %v10734_v47 = vpop.permute.xlu0 %8022 }
 0x15e   : > { %9210 = vmatprep.mubr.msk.f32.mxu1 %vm9575_vm0, %v9573_v0  ;;  %9213 = vmatprep.subr.mxu0 %v9573_v0  ;;  %v8806_v2 = vpop.f32.mrf.mxu1  ;;  %11240 = vst [vmem:[#allocation16_spill] sm:$0xff] %v10734_v47 }
 0x15f   : > { %9204 = vmatmul.mubr.f32.vlgmr.msra.gmra.mxu0 %v9775_v44  ;;  %9211 = vmatmul.mubr.f32.vlgmr.msra.gmra.mxu1 %v9775_v44 }
 0x160   : > { %9214 = vmatpush3.msra.mxu0 %v10630_v6  ;;  %9220 = vmatprep.subr.mxu1 %v9573_v0 }
 0x161   : > { %8208 = vperm.xlu0 %9460, %v9836_v5   ;;  %9215 = vmatprep.subr.mxu0 %v9573_v0  ;;  %v10739_v5 = vsub.f32 %v331_v24, %v10722_v54 }
 0x162   : > { %9221 = vmatpush3.msra.mxu1 %v5958_v1  ;;  %9216 = vmatpush3.msra.mxu0 %v10637_v15  ;;  %v1488_v46 = vpop.f32.mrf.mxu0 }
 0x163   : > { %9222 = vmatprep.subr.mxu1 %v9573_v0  ;;  %9217 = vmatprep.mubr.msk.f32.mxu0 %vm9575_vm0, %v9573_v0  ;;  %v1489_v39 = vadd.f32 %v1488_v46, %v1413_v49  ;;  %v1563_v23 = vpop.f32.mrf.mxu1  ;;  %v10746_v49 = vsub.f32 %v330_v43, %v10729_v21  ;;  %v10750_v24 = vpop.permute.xlu1 %8018 }
 0x164   : > { %9223 = vmatpush3.msra.mxu1 %v5965_v56  ;;  %9224 = vmatprep.mubr.msk.f32.mxu1 %vm9575_vm0, %v9573_v0  ;;  %v8813_v1 = vpop.f32.mrf.mxu0  ;;  %v6415_v56 = vand.u32 4294901760, %v10739_v5 }
 0x165   : > { %9227 = vmatprep.subr.mxu0 %v9573_v0  ;;  %9218 = vmatmul.mubr.f32.vlgmr.msra.gmra.mxu0 %v9824_v61  ;;  %v1564_v2 = vadd.f32 %v1563_v23, %v1489_v39  ;;  %v8820_v53 = vpop.f32.mrf.mxu1 }
 0x166   : > { %9225 = vmatmul.mubr.f32.vlgmr.msra.gmra.mxu1 %v9775_v44  ;;  %9228 = vmatpush3.msra.mxu0 %v10647_v41  ;;  %v8080_v53 = vpop.permute.xlu0 %8079  ;;  %v6416_v47 = vsub.f32 %v10739_v5, %v6415_v56  ;;  %v11242_v41 = vand.u32 4294901760, %v10746_v49 }
 0x167   : > { %9234 = vmatprep.subr.mxu1 %v9573_v0  ;;  %9229 = vmatprep.subr.mxu0 %v9573_v0  ;;  %v8139_v46 = vmul.f32 %v8080_v53, %v10672_v48 }
 0x168   : > { %9235 = vmatpush3.msra.mxu1 %v10630_v6  ;;  %9230 = vmatpush3.msra.mxu0 %v10654_v55 }
 0x169   : > { %9236 = vmatprep.subr.mxu1 %v9573_v0  ;;  %9231 = vmatprep.mubr.msk.f32.mxu0 %vm9575_vm0, %v9573_v0 }
 0x16a   : > { %9237 = vmatpush3.msra.mxu1 %v10637_v15  ;;  %9238 = vmatprep.mubr.msk.f32.mxu1 %vm9575_vm0, %v9573_v0  ;;  %v1640_v39 = vpop.f32.mrf.mxu0  ;;  %v1713_v23 = vpop.f32.mrf.mxu1 }
 0x16b   : > { %9241 = vmatprep.subr.mxu0 %v9573_v0  ;;  %9232 = vmatmul.mubr.f32.vlgmr.msra.gmra.mxu0 %v9788_v50  ;;  %v1641_v1 = vadd.f32 %v1640_v39, %v1564_v2  ;;  %v11241_v2 = vand.u32 4294901760, %v10654_v55  ;;  %v6417_v55 = vand.u32 4294901760, %v6416_v47 }
 0x16c   : > { %9239 = vmatmul.mubr.f32.vlgmr.msra.gmra.mxu1 %v9797_v52  ;;  %9242 = vmatpush3.msra.mxu0 %v5956_v20  ;;  %v8827_v11 = vpop.f32.mrf.mxu0  ;;  %v8834_v43 = vpop.f32.mrf.mxu1  ;;  %v6423_v20 = vsub.f32 %v10746_v49, %v11242_v41 }
 0x16d   : > { %9248 = vmatprep.subr.mxu1 %v9573_v0  ;;  %9243 = vmatprep.subr.mxu0 %v9573_v0  ;;  %v8076_v53 = vpop.permute.xlu1 %8075  ;;  %v10773_v63 = vadd.f32 %v1713_v23, %v1641_v1  ;;  %v8155_v43 = vsel %vm7928_vm14, %v8139_v46, 0.0  ;;  %v333_v23 = vld [vmem:[%s9701_s16 + $0xe8] sm:$0xff] }
 0x16e   : > { %9249 = vmatpush3.msra.mxu1 %v10630_v6  ;;  %9244 = vmatpush3.msra.mxu0 %v11241_v2  ;;  %v8138_v11 = vmul.f32 %v8076_v53, %v10578_v25 }
 0x16f   : > { %9250 = vmatprep.subr.mxu1 %v9573_v0  ;;  %9245 = vmatprep.mubr.msk.f32.mxu0 %vm9575_vm0, %v9573_v0  ;;  %v7914_v39 = vmul.f32 %v10392_v34, %v10773_v63  ;;  %v8027_v6 = vmul.f32 %v10463_v57, %v10773_v63  ;;  %v6424_v57 = vand.u32 4294901760, %v6423_v20 }
 0x170   : > { %9251 = vmatpush3.msra.mxu1 %v10637_v15  ;;  %9252 = vmatprep.mubr.msk.f32.mxu1 %vm9575_vm0, %v9573_v0  ;;  %v8154_v46 = vsel %vm7928_vm14, %v8138_v11, 0.0  ;;  %v332_v15 = vld [vmem:[%s9701_s16 + $0xe0] sm:$0xff] }
 0x171   : > { %9255 = vmatprep.subr.mxu0 %v9573_v0  ;;  %9246 = vmatmul.mubr.f32.vlgmr.msra.gmra.mxu0 %v9775_v44  ;;  %v8156_v1 = vadd.f32 %v8155_v43, %v8154_v46  ;;  %v7932_v34 = vsel %vm7928_vm14, %v7914_v39, 0.0  ;;  %v8044_v53 = vsel %vm7928_vm14, %v8027_v6, 0.0  ;;  %v1790_v2 = vpop.f32.mrf.mxu0  ;;  %v10810_v43 = vand.u32 4294901760, %v333_v23 }
 0x172   : > { %9253 = vmatmul.mubr.f32.vlgmr.msra.gmra.mxu1 %v9775_v44  ;;  %9256 = vmatpush3.msra.mxu0 %v10722_v54  ;;  %v10803_v47 = vadd.f32 %v7932_v34, %v10706_v3  ;;  %v10806_v41 = vadd.f32 %v8044_v53, %v10708_v40  ;;  %v1871_v11 = vpop.f32.mrf.mxu1  ;;  %v10815_v3 = vand.u32 4294901760, %v332_v15 }
 0x173   : > { %9262 = vmatprep.subr.mxu1 %v9573_v0  ;;  %8212 = vperm.xlu1 %9461, %v10060_v60   ;;  %v1872_v39 = vadd.f32 %v1871_v11, %v1790_v2  ;;  %v8841_v6 = vpop.f32.mrf.mxu0  ;;  %v10824_v60 = vsub.f32 %v333_v23, %v10810_v43 }
 0x174   : > { %9257 = vmatprep.subr.mxu0 %v9573_v0  ;;  %9263 = vmatpush3.msra.mxu1 %v6417_v55  ;;  %v8084_v20 = vpop.permute.xlu1 %8083  ;;  %v8848_v46 = vpop.f32.mrf.mxu1  ;;  %v10834_v2 = vsub.f32 %v332_v15, %v10815_v3 }
 0x175   : > { %9258 = vmatpush3.msra.mxu0 %v10729_v21  ;;  %9264 = vmatprep.subr.mxu1 %v9573_v0  ;;  %v8140_v40 = vmul.f32 %v8084_v20, %v10773_v63 }
 0x176   : > { %9259 = vmatprep.mubr.msk.f32.mxu0 %vm9575_vm0, %v9573_v0  ;;  %9265 = vmatpush3.msra.mxu1 %v6424_v57  ;;  %v11232_v15 = vand.u32 4294901760, %v10834_v2 }
 0x177   : > { %9266 = vmatprep.mubr.msk.f32.mxu1 %vm9575_vm0, %v9573_v0  ;;  %9269 = vmatprep.subr.mxu0 %v9573_v0  ;;  %v8157_v55 = vsel %vm7928_vm14, %v8140_v40, 0.0  ;;  %v10856_v40 = vpop.permute.xlu0 %8091 }
 0x178   : > { %9260 = vmatmul.mubr.f32.vlgmr.msra.gmra.mxu0 %v9824_v61  ;;  %9267 = vmatmul.mubr.f32.vlgmr.msra.gmra.mxu1 %v9775_v44  ;;  %v10829_v34 = vadd.f32 %v8157_v55, %v8156_v1  ;;  %v1947_v53 = vpop.f32.mrf.mxu0  ;;  %v11233_v1 = vand.u32 4294901760, %v10824_v60 }
 0x179   : > { %9270 = vmatpush3.msra.mxu0 %v10739_v5  ;;  %9276 = vmatprep.subr.mxu1 %v9573_v0  ;;  %v1948_v57 = vadd.f32 %v1947_v53, %v1872_v39  ;;  %v2022_v11 = vpop.f32.mrf.mxu1  ;;  %v6882_v5 = vsub.f32 %v10834_v2, %v11232_v15 }
 0x17a   : > { %9271 = vmatprep.subr.mxu0 %v9573_v0  ;;  %9277 = vmatpush3.msra.mxu1 %v10722_v54  ;;  %v8855_v23 = vpop.f32.mrf.mxu0  ;;  %v6875_v39 = vsub.f32 %v10824_v60, %v11233_v1 }
 0x17b   : > { %9272 = vmatpush3.msra.mxu0 %v10746_v49  ;;  %9278 = vmatprep.subr.mxu1 %v9573_v0  ;;  %v2023_v6 = vadd.f32 %v2022_v11, %v1948_v57  ;;  %v8862_v20 = vpop.f32.mrf.mxu1  ;;  %v8088_v46 = vpop.permute.xlu1 %8087  ;;  %v11243_v57 = vand.u32 4294901760, %v10746_v49  ;;  %v335_v49 = vld [vmem:[%s9701_s16 + $0xf8] sm:$0xff] }
 0x17c   : > { %9273 = vmatprep.mubr.msk.f32.mxu0 %vm9575_vm0, %v9573_v0  ;;  %9279 = vmatpush3.msra.mxu1 %v10729_v21 }
 0x17d   : > { %9280 = vmatprep.mubr.msk.f32.mxu1 %vm9575_vm0, %v9573_v0  ;;  %9283 = vmatprep.subr.mxu0 %v9573_v0 }
 0x17e   : > { %9274 = vmatmul.mubr.f32.vlgmr.msra.gmra.mxu0 %v9788_v50  ;;  %9281 = vmatmul.mubr.f32.vlgmr.msra.gmra.mxu1 %v9797_v52 }
 0x17f   : > { %9284 = vmatpush3.msra.mxu0 %v6415_v56  ;;  %9290 = vmatprep.subr.mxu1 %v9573_v0 }
 0x180   : > { %9285 = vmatprep.subr.mxu0 %v9573_v0  ;;  %9291 = vmatpush3.msra.mxu1 %v10722_v54  ;;  %v2099_v55 = vpop.f32.mrf.mxu0  ;;  %v2172_v53 = vpop.f32.mrf.mxu1  ;;  %v6876_v54 = vand.u32 4294901760, %v6875_v39 }
 0x181   : > { %9286 = vmatpush3.msra.mxu0 %v11243_v57  ;;  %9292 = vmatprep.subr.mxu1 %v9573_v0  ;;  %v2100_v56 = vadd.f32 %v2099_v55, %v2023_v6  ;;  %v334_v6 = vld [vmem:[%s9701_s16 + $0xf0] sm:$0xff]  ;;  %v10887_v57 = vand.u32 4294901760, %v335_v49  ;;  %s8315_s16 = sshll.u32 %s169_s27, 4  ;;  %s11171_s16 = int_to_ptr.vmem [resolvable:$true] %s8315_s16 }
 0x182   : > { %9287 = vmatprep.mubr.msk.f32.mxu0 %vm9575_vm0, %v9573_v0  ;;  %9293 = vmatpush3.msra.mxu1 %v10729_v21  ;;  %v8869_v11 = vpop.f32.mrf.mxu0  ;;  %v8876_v20 = vpop.f32.mrf.mxu1  ;;  %v6883_v21 = vand.u32 4294901760, %v6882_v5  ;;  %s9502_s22 = scalar_lea.vmem %s11171_s16, 256  ;;  %p9509_p7 = scmp.lt.s32.totalorder %s11171_s16, %s9507_s0 }
 0x183   : > { %9294 = vmatprep.mubr.msk.f32.mxu1 %vm9575_vm0, %v9573_v0  ;;  %9297 = vmatprep.subr.mxu0 %v9573_v0  ;;  %v10873_v23 = vadd.f32 %v2172_v53, %v2100_v56  ;;  %v10889_v56 = vpop.permute.xlu0 %8099  ;;  %v10891_v11 = vpop.permute.xlu1 %8095  ;;  %v10916_v1 = vsub.f32 %v335_v49, %v10887_v57  ;;  %p9503_p4 = scmp.ne.s32.totalorder %s11171_s16, %s9502_s22  ;;  %p9510_p8 = scmp.lt.s32.totalorder %s9508_s30, %s9502_s22 }
 0x184   : > { %9288 = vmatmul.mubr.f32.vlgmr.msra.gmra.mxu0 %v9775_v44  ;;  %9295 = vmatmul.mubr.f32.vlgmr.msra.gmra.mxu1 %v9775_v44 }
 0x185   : > { %9298 = vmatpush3.msra.mxu0 %v10810_v43  ;;  %9304 = vmatprep.subr.mxu1 %v9573_v0  ;;  %v7915_v55 = vmul.f32 %v10536_v32, %v10873_v23  ;;  %v8028_v39 = vmul.f32 %v10590_v37, %v10873_v23  ;;  %v8141_v53 = vmul.f32 %v8088_v46, %v10873_v23  ;;  %p9504_p5 = pnand %p9503_p4, %p9650_p0  ;;  %p9511_p9 = por %p9510_p8, %p9509_p7 }
 0x186   : > { %8216 = vperm.xlu0 %9460, %v9847_v7   ;;  %9299 = vmatprep.subr.mxu0 %v9573_v0  ;;  %v10900_v7 = vand.u32 4294901760, %v334_v6 }
 0x187   : > { %9305 = vmatpush3.msra.mxu1 %v6876_v54  ;;  %9300 = vmatpush3.msra.mxu0 %v10815_v3  ;;  %v7934_v32 = vsel %vm7928_vm14, %v7915_v55, 0.0  ;;  %v8046_v5 = vsel %vm7928_vm14, %v8028_v39, 0.0  ;;  %v8159_v37 = vsel %vm7928_vm14, %v8141_v53, 0.0  ;;  %v2249_v46 = vpop.f32.mrf.mxu0  ;;  %v2330_v20 = vpop.f32.mrf.mxu1  ;;  %p9505_p6 = pneg %p9504_p5 }
 0x188   : > { %9306 = vmatprep.subr.mxu1 %v9573_v0  ;;  %9301 = vmatprep.mubr.msk.f32.mxu0 %vm9575_vm0, %v9573_v0  ;;  %v10903_v15 = vadd.f32 %v7934_v32, %v10803_v47  ;;  %v10906_v54 = vadd.f32 %v8046_v5, %v10806_v41  ;;  %v10909_v55 = vadd.f32 %v8159_v37, %v10829_v34  ;;  %v8189_v49 = vpop.permute.xlu0 %8188 }
 0x189   : > { %9307 = vmatpush3.msra.mxu1 %v6883_v21  ;;  %9308 = vmatprep.mubr.msk.f32.mxu1 %vm9575_vm0, %v9573_v0  ;;  %v2331_v39 = vadd.f32 %v2330_v20, %v2249_v46  ;;  %v8883_v53 = vpop.f32.mrf.mxu0  ;;  %v8890_v47 = vpop.f32.mrf.mxu1  ;;  %v10923_v41 = vsub.f32 %v334_v6, %v10900_v7  ;;  %p9512_p10 = pnand %p9511_p9, %p9505_p6 }
 0x18a   : > { %9311 = vmatprep.subr.mxu0 %v9573_v0  ;;  %9302 = vmatmul.mubr.f32.vlgmr.msra.gmra.mxu0 %v9824_v61  ;;  %v10925_v34 = vpop.permute.xlu1 %8103  ;;  %v11244_v53 = vand.u32 4294901760, %v10824_v60  ;;  %v8251_v47 = vmul.f32 %v8189_v49, %v10578_v25 }
 0x18b   : > { %9309 = vmatmul.mubr.f32.vlgmr.msra.gmra.mxu1 %v9775_v44  ;;  %9312 = vmatpush3.msra.mxu0 %v10824_v60  ;;  %v7340_v37 = vand.u32 4294901760, %v10923_v41 }
 0x18c   : > { %9318 = vmatprep.subr.mxu1 %v9573_v0  ;;  %9313 = vmatprep.subr.mxu0 %v9573_v0 }
 0x18d   : > { %9319 = vmatpush3.msra.mxu1 %v10810_v43  ;;  %9314 = vmatpush3.msra.mxu0 %v10834_v2  ;;  %v7341_v25 = vsub.f32 %v10923_v41, %v7340_v37 }
 0x18e   : > { %9320 = vmatprep.subr.mxu1 %v9573_v0  ;;  %9315 = vmatprep.mubr.msk.f32.mxu0 %vm9575_vm0, %v9573_v0  ;;  %v2406_v32 = vpop.f32.mrf.mxu0  ;;  %v2481_v5 = vpop.f32.mrf.mxu1 }
 0x18f   : > { %9321 = vmatpush3.msra.mxu1 %v10815_v3  ;;  %9322 = vmatprep.mubr.msk.f32.mxu1 %vm9575_vm0, %v9573_v0  ;;  %v2407_v6 = vadd.f32 %v2406_v32, %v2331_v39  ;;  %v11245_v39 = vand.u32 4294901760, %v10916_v1 }
 0x190   : > { %9325 = vmatprep.subr.mxu0 %v9573_v0  ;;  %9316 = vmatmul.mubr.f32.vlgmr.msra.gmra.mxu0 %v9788_v50  ;;  %v8897_v46 = vpop.f32.mrf.mxu0  ;;  %v8904_v20 = vpop.f32.mrf.mxu1 }
 0x191   : > { %9323 = vmatmul.mubr.f32.vlgmr.msra.gmra.mxu1 %v9797_v52  ;;  %9326 = vmatpush3.msra.mxu0 %v11244_v53  ;;  %v2482_v21 = vadd.f32 %v2481_v5, %v2407_v6  ;;  %v7334_v32 = vsub.f32 %v10916_v1, %v11245_v39  ;;  %v11246_v46 = vand.u32 4294901760, %v10834_v2  ;;  %v7342_v53 = vand.u32 4294901760, %v7341_v25 }
 0x192   : > { %9332 = vmatprep.subr.mxu1 %v9573_v0  ;;  %9327 = vmatprep.subr.mxu0 %v9573_v0  ;;  %v8193_v36 = vpop.permute.xlu1 %8192 }
 0x193   : > { %9333 = vmatpush3.msra.mxu1 %v10810_v43  ;;  %9328 = vmatpush3.msra.mxu0 %v11246_v46  ;;  %v8252_v60 = vmul.f32 %v8193_v36, %v10672_v48  ;;  %v8267_v43 = vsel %vm7928_vm14, %v8251_v47, 0.0  ;;  %v11247_v36 = vmov 2   ;;  %v7335_v48 = vand.u32 4294901760, %v7334_v32 }
 0x194   : > { %9334 = vmatprep.subr.mxu1 %v9573_v0  ;;  %9329 = vmatprep.mubr.msk.f32.mxu0 %vm9575_vm0, %v9573_v0 }
 0x195   : > { %9335 = vmatpush3.msra.mxu1 %v10815_v3  ;;  %9336 = vmatprep.mubr.msk.f32.mxu1 %vm9575_vm0, %v9573_v0  ;;  %v8268_v2 = vsel %vm7928_vm14, %v8252_v60, 0.0  ;;  %v2558_v49 = vpop.f32.mrf.mxu0 }
 0x196   : > { %9339 = vmatprep.subr.mxu0 %v9573_v0  ;;  %9462 = vset.pattern.permute.xlu1 %v11247_v36  ;;  %v10965_v5 = vadd.f32 %v8268_v2, %v8267_v43  ;;  %v2559_v6 = vadd.f32 %v2558_v49, %v2482_v21  ;;  %v2631_v20 = vpop.f32.mrf.mxu1 }
 0x197   : > { %9330 = vmatmul.mubr.f32.vlgmr.msra.gmra.mxu0 %v9775_v44  ;;  %9337 = vmatmul.mubr.f32.vlgmr.msra.gmra.mxu1 %v9775_v44  ;;  %v8911_v3 = vpop.f32.mrf.mxu0 }
 0x198   : > { %9340 = vmatpush3.msra.mxu0 %v10887_v57  ;;  %9346 = vmatprep.subr.mxu1 %v9573_v0  ;;  %v10971_v47 = vadd.f32 %v2631_v20, %v2559_v6  ;;  %v8918_v39 = vpop.f32.mrf.mxu1 }
 0x199   : > { %8220 = vperm.xlu0 %9460, %v9782_v8   ;;  %8107 = vperm.xlu1 %9462, %v9782_v8  }
 0x19a   : > { %9341 = vmatprep.subr.mxu0 %v9573_v0  ;;  %9347 = vmatpush3.msra.mxu1 %v7335_v48  ;;  %v7916_v21 = vmul.f32 %v10442_v51, %v10971_v47  ;;  %v8029_v32 = vmul.f32 %v10485_v16, %v10971_v47  ;;  %v8142_v46 = vmul.f32 %v10856_v40, %v10971_v47 }
 0x19b   : > { %9342 = vmatpush3.msra.mxu0 %v10900_v7  ;;  %9348 = vmatprep.subr.mxu1 %v9573_v0 }
 0x19c   : > { %9343 = vmatprep.mubr.msk.f32.mxu0 %vm9575_vm0, %v9573_v0  ;;  %9349 = vmatpush3.msra.mxu1 %v7342_v53  ;;  %v7936_v8 = vsel %vm7928_vm14, %v7916_v21, 0.0  ;;  %v8048_v60 = vsel %vm7928_vm14, %v8029_v32, 0.0  ;;  %v8161_v51 = vsel %vm7928_vm14, %v8142_v46, 0.0  ;;  %v2708_v25 = vpop.f32.mrf.mxu0 }
 0x19d   : > { %9350 = vmatprep.mubr.msk.f32.mxu1 %vm9575_vm0, %v9573_v0  ;;  %9353 = vmatprep.subr.mxu0 %v9573_v0  ;;  %v7937_v16 = vadd.f32 %v7936_v8, %v10903_v15  ;;  %v8049_v40 = vadd.f32 %v8048_v60, %v10906_v54  ;;  %v2789_v43 = vpop.f32.mrf.mxu1  ;;  %v8162_v2 = vadd.f32 %v8161_v51, %v10909_v55  ;;  %v11248_v54 = vand.u32 4294901760, %v10916_v1 }
 0x19e   : > { %9344 = vmatmul.mubr.f32.vlgmr.msra.gmra.mxu0 %v9824_v61  ;;  %9351 = vmatmul.mubr.f32.vlgmr.msra.gmra.mxu1 %v9775_v44  ;;  %v2790_v49 = vadd.f32 %v2789_v43, %v2708_v25  ;;  %v8925_v36 = vpop.f32.mrf.mxu0 }
 0x19f   : > { %9354 = vmatpush3.msra.mxu0 %v10916_v1  ;;  %9360 = vmatprep.subr.mxu1 %v9573_v0  ;;  %v8932_v48 = vpop.f32.mrf.mxu1 }
 0x1a0   : > { %9355 = vmatprep.subr.mxu0 %v9573_v0  ;;  %9361 = vmatpush3.msra.mxu1 %v10887_v57 }
 0x1a1   : > { %9356 = vmatpush3.msra.mxu0 %v10923_v41  ;;  %9362 = vmatprep.subr.mxu1 %v9573_v0 }
 0x1a2   : > { %9357 = vmatprep.mubr.msk.f32.mxu0 %vm9575_vm0, %v9573_v0  ;;  %9363 = vmatpush3.msra.mxu1 %v10900_v7 }
 0x1a3   : > { %9364 = vmatprep.mubr.msk.f32.mxu1 %vm9575_vm0, %v9573_v0  ;;  %9367 = vmatprep.subr.mxu0 %v9573_v0 }
 0x1a4   : > { %9358 = vmatmul.mubr.f32.vlgmr.msra.gmra.mxu0 %v9788_v50  ;;  %9365 = vmatmul.mubr.f32.vlgmr.msra.gmra.mxu1 %v9797_v52  ;;  %v8197_v61 = vpop.permute.xlu1 %8196  ;;  %v2865_v15 = vpop.f32.mrf.mxu0 }
 0x1a5   : > { %9368 = vmatpush3.msra.mxu0 %v11248_v54  ;;  %9374 = vmatprep.subr.mxu1 %v9573_v0  ;;  %v8253_v55 = vmul.f32 %v8197_v61, %v10773_v63  ;;  %v2866_v6 = vadd.f32 %v2865_v15, %v2790_v49  ;;  %v2940_v20 = vpop.f32.mrf.mxu1 }
 0x1a6   : > { %9369 = vmatprep.subr.mxu0 %v9573_v0  ;;  %9375 = vmatpush3.msra.mxu1 %v10887_v57  ;;  %v8939_v3 = vpop.f32.mrf.mxu0 }
 0x1a7   : > { %9370 = vmatpush3.msra.mxu0 %v7340_v37  ;;  %9376 = vmatprep.subr.mxu1 %v9573_v0  ;;  %v8270_v50 = vsel %vm7928_vm14, %v8253_v55, 0.0  ;;  %v2941_v52 = vadd.f32 %v2940_v20, %v2866_v6  ;;  %v8946_v1 = vpop.f32.mrf.mxu1 }
 0x1a8   : > { %9371 = vmatprep.mubr.msk.f32.mxu0 %vm9575_vm0, %v9573_v0  ;;  %9377 = vmatpush3.msra.mxu1 %v10900_v7  ;;  %v8271_v63 = vadd.f32 %v8270_v50, %v10965_v5 }
 0x1a9   : > { %9378 = vmatprep.mubr.msk.f32.mxu1 %vm9575_vm0, %v9573_v0  ;;  %9372 = vmatmul.mubr.f32.vlgmr.msra.gmra.mxu0 %v9775_v44 }
 0x1aa   : > { %9379 = vmatmul.mubr.f32.vlgmr.msra.gmra.mxu1 %v9775_v44  ;;  %8224 = vperm.xlu0 %9460, %v9882_v13  }
 0x1ab   : > { %8111 = vperm.xlu1 %9462, %v9882_v13   ;;  %v3017_v57 = vpop.f32.mrf.mxu0 }
 0x1ac   : > { %v3018_v41 = vadd.f32 %v3017_v57, %v2941_v52  ;;  %v3090_v37 = vpop.f32.mrf.mxu1 }
 0x1ad   : > { %v8953_v53 = vpop.f32.mrf.mxu0 }
 0x1ae   : > { %8228 = vperm.xlu0 %9460, %v9961_v35   ;;  %v11032_v7 = vadd.f32 %v3090_v37, %v3018_v41  ;;  %v8960_v5 = vpop.f32.mrf.mxu1 }
 0x1af   : > { %8115 = vperm.xlu1 %9462, %v9961_v35  }
 0x1b0   : > { %v7917_v0 = vmul.f32 %v10559_v58, %v11032_v7  ;;  %v8030_v44 = vmul.f32 %v10617_v59, %v11032_v7  ;;  %v8143_v13 = vmul.f32 %v10891_v11, %v11032_v7 }
 0x1b2   : > { %8232 = vperm.xlu0 %9460, %v10101_v19   ;;  %v7938_v39 = vsel %vm7928_vm14, %v7917_v0, 0.0  ;;  %v8050_v21 = vsel %vm7928_vm14, %v8030_v44, 0.0  ;;  %v8163_v32 = vsel %vm7928_vm14, %v8143_v13, 0.0 }
 0x1b3   : > { %8119 = vperm.xlu1 %9462, %v10101_v19   ;;  %v7939_v35 = vadd.f32 %v7938_v39, %v7937_v16  ;;  %v8051_v46 = vadd.f32 %v8050_v21, %v8049_v40  ;;  %v3167_v8 = vpop.f32.mrf.mxu0  ;;  %v3248_v58 = vpop.f32.mrf.mxu1  ;;  %v8164_v60 = vadd.f32 %v8163_v32, %v8162_v2 }
 0x1b4   : > { %v3249_v51 = vadd.f32 %v3248_v58, %v3167_v8 }
 0x1b5   : > { %v8967_v59 = vpop.f32.mrf.mxu0  ;;  %v8974_v25 = vpop.f32.mrf.mxu1 }
 0x1b6   : > { %8236 = vperm.xlu0 %9460, %v9988_v29  }
 0x1b7   : > { %8123 = vperm.xlu1 %9462, %v9988_v29   ;;  %v8201_v11 = vpop.permute.xlu0 %8200 }
 0x1b8   : > { %v8254_v43 = vmul.f32 %v8201_v11, %v10873_v23 }
 0x1ba   : > { %8240 = vperm.xlu0 %9460, %v9841_v14   ;;  %v8272_v49 = vsel %vm7928_vm14, %v8254_v43, 0.0  ;;  %v3324_v19 = vpop.f32.mrf.mxu0  ;;  %v3399_v16 = vpop.f32.mrf.mxu1 }
 0x1bb   : > { %8127 = vperm.xlu1 %9462, %v9841_v14   ;;  %v8273_v40 = vadd.f32 %v8272_v49, %v8271_v63  ;;  %v3325_v2 = vadd.f32 %v3324_v19, %v3249_v51 }
 0x1bc   : > { %v8981_v36 = vpop.f32.mrf.mxu0  ;;  %v8988_v48 = vpop.f32.mrf.mxu1 }
 0x1bd   : > { %v3400_v61 = vadd.f32 %v3399_v16, %v3325_v2 }
 0x1be   : > { %8244 = vperm.xlu0 %9460, %v10083_v12  }
 0x1bf   : > { %8131 = vperm.xlu1 %9462, %v10083_v12  }
 0x1c1   : > { %v3476_v29 = vpop.f32.mrf.mxu0  ;;  %v3549_v15 = vpop.f32.mrf.mxu1 }
 0x1c2   : > { %8248 = vperm.xlu0 %9460, %v9853_v17   ;;  %v3477_v23 = vadd.f32 %v3476_v29, %v3400_v61 }
 0x1c3   : > { %8135 = vperm.xlu1 %9462, %v9853_v17   ;;  %v8995_v54 = vpop.f32.mrf.mxu0  ;;  %v9002_v55 = vpop.f32.mrf.mxu1 }
 0x1c4   : > { %v11056_v6 = vadd.f32 %v3549_v15, %v3477_v23 }
 0x1c6   : > { %v7918_v14 = vmul.f32 %v10542_v38, %v11056_v6  ;;  %v8031_v20 = vmul.f32 %v10633_v27, %v11056_v6  ;;  %v8144_v12 = vmul.f32 %v10889_v56, %v11056_v6 }
 0x1c8   : > { %v7940_v3 = vsel %vm7928_vm14, %v7918_v14, 0.0  ;;  %v8052_v50 = vsel %vm7928_vm14, %v8031_v20, 0.0  ;;  %v3626_v52 = vpop.f32.mrf.mxu0  ;;  %v3707_v1 = vpop.f32.mrf.mxu1  ;;  %v8165_v17 = vsel %vm7928_vm14, %v8144_v12, 0.0 }
 0x1c9   : > { %v8205_v63 = vpop.permute.xlu1 %8204  ;;  %v7941_v57 = vadd.f32 %v7940_v3, %v7939_v35  ;;  %v8053_v41 = vadd.f32 %v8052_v50, %v8051_v46  ;;  %v3708_v37 = vadd.f32 %v3707_v1, %v3626_v52  ;;  %v8166_v53 = vadd.f32 %v8165_v17, %v8164_v60 }
 0x1ca   : > { %v8255_v38 = vmul.f32 %v8205_v63, %v10971_v47  ;;  %v9009_v5 = vpop.f32.mrf.mxu0  ;;  %v9016_v27 = vpop.f32.mrf.mxu1 }
 0x1cc   : > { %v8274_v0 = vsel %vm7928_vm14, %v8255_v38, 0.0 }
 0x1cd   : > { %v8275_v56 = vadd.f32 %v8274_v0, %v8273_v40 }
 0x1ce   : > { %v3783_v44 = vpop.f32.mrf.mxu0 }
 0x1cf   : > { %v3784_v13 = vadd.f32 %v3783_v44, %v3708_v37  ;;  %v3858_v39 = vpop.f32.mrf.mxu1 }
 0x1d0   : > { %v9023_v21 = vpop.f32.mrf.mxu0 }
 0x1d1   : > { %v3859_v32 = vadd.f32 %v3858_v39, %v3784_v13  ;;  %v9030_v8 = vpop.f32.mrf.mxu1 }
 0x1d5   : > { %v3935_v58 = vpop.f32.mrf.mxu0  ;;  %v4008_v51 = vpop.f32.mrf.mxu1 }
 0x1d6   : > { %v3936_v59 = vadd.f32 %v3935_v58, %v3859_v32 }
 0x1d7   : > { %v9037_v35 = vpop.f32.mrf.mxu0  ;;  %v9044_v46 = vpop.f32.mrf.mxu1 }
 0x1d8   : > { %v11069_v25 = vadd.f32 %v4008_v51, %v3936_v59 }
 0x1da   : > { %v7919_v47 = vmul.f32 %v10658_v4, %v11069_v25  ;;  %v8032_v60 = vmul.f32 %v10639_v45, %v11069_v25  ;;  %v8145_v11 = vmul.f32 %v10925_v34, %v11069_v25 }
 0x1db   : > { %v4085_v43 = vpop.f32.mrf.mxu0 }
 0x1dc   : > { %v8209_v49 = vpop.permute.xlu0 %8208  ;;  %v7942_v19 = vsel %vm7928_vm14, %v7919_v47, 0.0  ;;  %v8054_v16 = vsel %vm7928_vm14, %v8032_v60, 0.0  ;;  %v4166_v40 = vpop.f32.mrf.mxu1  ;;  %v8167_v2 = vsel %vm7928_vm14, %v8145_v11, 0.0 }
 0x1dd   : > { %v8256_v36 = vmul.f32 %v8209_v49, %v11032_v7  ;;  %v7943_v48 = vadd.f32 %v7942_v19, %v7941_v57  ;;  %v8055_v61 = vadd.f32 %v8054_v16, %v8053_v41  ;;  %v4167_v4 = vadd.f32 %v4166_v40, %v4085_v43  ;;  %v9051_v29 = vpop.f32.mrf.mxu0 }
 0x1de   : > { %v9058_v15 = vpop.f32.mrf.mxu1  ;;  %v11081_v45 = vadd.f32 %v8167_v2, %v8166_v53 }
 0x1df   : > { %v8276_v34 = vsel %vm7928_vm14, %v8256_v36, 0.0 }
 0x1e0   : > { %v8277_v23 = vadd.f32 %v8276_v34, %v8275_v56 }
 0x1e1   : > { %v4242_v54 = vpop.f32.mrf.mxu0 }
 0x1e2   : > { %v4243_v55 = vadd.f32 %v4242_v54, %v4167_v4  ;;  %v4317_v14 = vpop.f32.mrf.mxu1 }
 0x1e3   : > { %v9065_v20 = vpop.f32.mrf.mxu0 }
 0x1e4   : > { %v4318_v12 = vadd.f32 %v4317_v14, %v4243_v55  ;;  %v9072_v3 = vpop.f32.mrf.mxu1 }
 0x1e7   : > { %v4394_v50 = vpop.f32.mrf.mxu0 }
 0x1e8   : > { %v4395_v52 = vadd.f32 %v4394_v50, %v4318_v12  ;;  %v4467_v1 = vpop.f32.mrf.mxu1 }
 0x1e9   : > { %v9079_v7 = vpop.f32.mrf.mxu0 }
 0x1ea   : > { %v11084_v17 = vadd.f32 %v4467_v1, %v4395_v52  ;;  %v9086_v63 = vpop.f32.mrf.mxu1 }
 0x1ec   : > { %v7920_v57 = vmul.f32 %v10373_v30, %v11084_v17  ;;  %v8033_v41 = vmul.f32 %v10368_v26, %v11084_v17 }
 0x1ee   : > { %v8213_v37 = vpop.permute.xlu1 %8212  ;;  %v7944_v53 = vsel %vm7928_vm14, %v7920_v57, 0.0  ;;  %v8056_v38 = vsel %vm7928_vm14, %v8033_v41, 0.0  ;;  %v4544_v5 = vpop.f32.mrf.mxu0 }
 0x1ef   : > { %v8257_v27 = vmul.f32 %v8213_v37, %v11056_v6  ;;  %v7945_v0 = vadd.f32 %v7944_v53, %v7943_v48  ;;  %v8057_v56 = vadd.f32 %v8056_v38, %v8055_v61  ;;  %v4625_v44 = vpop.f32.mrf.mxu1 }
 0x1f0   : > { %v4626_v13 = vadd.f32 %v4625_v44, %v4544_v5  ;;  %v9093_v39 = vpop.f32.mrf.mxu0 }
 0x1f1   : > { %v8278_v21 = vsel %vm7928_vm14, %v8257_v27, 0.0  ;;  %v9100_v32 = vpop.f32.mrf.mxu1 }
 0x1f2   : > { %v8279_v30 = vadd.f32 %v8278_v21, %v8277_v23 }
 0x1f4   : > { %v4701_v8 = vpop.f32.mrf.mxu0  ;;  %v4776_v58 = vpop.f32.mrf.mxu1 }
 0x1f5   : > { %v4702_v26 = vadd.f32 %v4701_v8, %v4626_v13 }
 0x1f6   : > { %v9107_v51 = vpop.f32.mrf.mxu0  ;;  %v9114_v59 = vpop.f32.mrf.mxu1 }
 0x1f7   : > { %v4777_v35 = vadd.f32 %v4776_v58, %v4702_v26 }
 0x1fa   : > { %v4853_v46 = vpop.f32.mrf.mxu0  ;;  %v4926_v47 = vpop.f32.mrf.mxu1 }
 0x1fb   : > { %v4854_v60 = vadd.f32 %v4853_v46, %v4777_v35 }
 0x1fc   : > { %v9121_v11 = vpop.f32.mrf.mxu0  ;;  %v9128_v6 = vpop.f32.mrf.mxu1 }
 0x1fd   : > { %v11094_v43 = vadd.f32 %v4926_v47, %v4854_v60 }
 0x1ff   : > { %v7921_v49 = vmul.f32 %v10412_v42, %v11094_v43  ;;  %v8034_v19 = vmul.f32 %v10514_v9, %v11094_v43 }
 0x200   : > { %v5003_v16 = vpop.f32.mrf.mxu0 }
 0x201   : > { %v8217_v40 = vpop.permute.xlu0 %8216  ;;  %v7946_v2 = vsel %vm7928_vm14, %v7921_v49, 0.0  ;;  %v8058_v36 = vsel %vm7928_vm14, %v8034_v19, 0.0  ;;  %v5084_v48 = vpop.f32.mrf.mxu1 }
 0x202   : > { %v8258_v61 = vmul.f32 %v8217_v40, %v11069_v25  ;;  %v7947_v4 = vadd.f32 %v7946_v2, %v7945_v0  ;;  %v8059_v29 = vadd.f32 %v8058_v36, %v8057_v56  ;;  %v5085_v15 = vadd.f32 %v5084_v48, %v5003_v16  ;;  %v9135_v34 = vpop.f32.mrf.mxu0 }
 0x203   : > { %v9142_v23 = vpop.f32.mrf.mxu1 }
 0x204   : > { %v8280_v54 = vsel %vm7928_vm14, %v8258_v61, 0.0 }
 0x205   : > { %v8281_v42 = vadd.f32 %v8280_v54, %v8279_v30 }
 0x206   : > { %v5160_v55 = vpop.f32.mrf.mxu0 }
 0x207   : > { %v5161_v14 = vadd.f32 %v5160_v55, %v5085_v15  ;;  %v5235_v9 = vpop.f32.mrf.mxu1 }
 0x208   : > { %v9149_v20 = vpop.f32.mrf.mxu0 }
 0x209   : > { %v5236_v12 = vadd.f32 %v5235_v9, %v5161_v14  ;;  %v9156_v3 = vpop.f32.mrf.mxu1 }
 0x20c   : > { %v5312_v50 = vpop.f32.mrf.mxu0 }
 0x20d   : > { %v5313_v52 = vadd.f32 %v5312_v50, %v5236_v12  ;;  %v5385_v1 = vpop.f32.mrf.mxu1 }
 0x20e   : > { %v9163_v7 = vpop.f32.mrf.mxu0 }
 0x20f   : > { %v5386_v63 = vadd.f32 %v5385_v1, %v5313_v52  ;;  %v9170_v25 = vpop.f32.mrf.mxu1 }
 0x211   : > { %v7922_v57 = vmul.f32 %v10469_v62, %v5386_v63  ;;  %v8035_v41 = vmul.f32 %v10509_v22, %v5386_v63 }
 0x213   : > { %v7948_v37 = vsel %vm7928_vm14, %v7922_v57, 0.0  ;;  %v8060_v53 = vsel %vm7928_vm14, %v8035_v41, 0.0  ;;  %v5462_v38 = vpop.f32.mrf.mxu0  ;;  %v5543_v5 = vpop.f32.mrf.mxu1 }
 0x214   : > { %v8221_v27 = vpop.permute.xlu0 %8220  ;;  %v8108_v0 = vpop.permute.xlu1 %8107  ;;  %v7949_v56 = vadd.f32 %v7948_v37, %v7947_v4  ;;  %v8061_v44 = vadd.f32 %v8060_v53, %v8059_v29  ;;  %v5544_v13 = vadd.f32 %v5543_v5, %v5462_v38 }
 0x215   : > { %v8259_v39 = vmul.f32 %v8221_v27, %v11084_v17  ;;  %v8146_v21 = vmul.f32 %v8108_v0, %v11084_v17  ;;  %v9177_v32 = vpop.f32.mrf.mxu0  ;;  %v9184_v30 = vpop.f32.mrf.mxu1 }
 0x217   : > { %v8282_v62 = vsel %vm7928_vm14, %v8259_v39, 0.0  ;;  %v8169_v22 = vsel %vm7928_vm14, %v8146_v21, 0.0 }
 0x218   : > { %v8283_v8 = vadd.f32 %v8282_v62, %v8281_v42  ;;  %v8170_v58 = vadd.f32 %v8169_v22, %v11081_v45 }
 0x219   : > { %v5619_v26 = vpop.f32.mrf.mxu0  ;;  %v5694_v51 = vpop.f32.mrf.mxu1 }
 0x21a   : > { %v5620_v59 = vadd.f32 %v5619_v26, %v5544_v13 }
 0x21b   : > { %v9191_v35 = vpop.f32.mrf.mxu0  ;;  %v9198_v46 = vpop.f32.mrf.mxu1 }
 0x21c   : > { %v5695_v47 = vadd.f32 %v5694_v51, %v5620_v59 }
 0x21f   : > { %v5771_v60 = vpop.f32.mrf.mxu0  ;;  %v5844_v11 = vpop.f32.mrf.mxu1 }
 0x220   : > { %v5772_v6 = vadd.f32 %v5771_v60, %v5695_v47 }
 0x221   : > { %v9205_v49 = vpop.f32.mrf.mxu0  ;;  %v9212_v17 = vpop.f32.mrf.mxu1 }
 0x222   : > { %v5845_v19 = vadd.f32 %v5844_v11, %v5772_v6 }
 0x224   : > { %v7923_v16 = vmul.f32 %v10585_v33, %v5845_v19  ;;  %v8036_v40 = vmul.f32 %v10663_v10, %v5845_v19 }
 0x225   : > { %v8225_v2 = vpop.permute.xlu0 %8224  ;;  %v5921_v36 = vpop.f32.mrf.mxu0 }
 0x226   : > { %v8260_v45 = vmul.f32 %v8225_v2, %v11094_v43  ;;  %v8112_v48 = vpop.permute.xlu1 %8111  ;;  %v7950_v61 = vsel %vm7928_vm14, %v7923_v16, 0.0  ;;  %v8062_v4 = vsel %vm7928_vm14, %v8036_v40, 0.0  ;;  %v6002_v29 = vpop.f32.mrf.mxu1 }
 0x227   : > { %v8147_v15 = vmul.f32 %v8112_v48, %v11094_v43  ;;  %v11119_v34 = vadd.f32 %v7950_v61, %v7949_v56  ;;  %v8063_v23 = vadd.f32 %v8062_v4, %v8061_v44  ;;  %v9219_v54 = vpop.f32.mrf.mxu0  ;;  %v6003_v3 = vadd.f32 %v6002_v29, %v5921_v36 }
 0x228   : > { %v8284_v33 = vsel %vm7928_vm14, %v8260_v45, 0.0  ;;  %v9226_v42 = vpop.f32.mrf.mxu1 }
 0x229   : > { %v8285_v10 = vadd.f32 %v8284_v33, %v8283_v8  ;;  %v8171_v55 = vsel %vm7928_vm14, %v8147_v15, 0.0  ;;  %v8229_v14 = vpop.permute.xlu0 %8228 }
 0x22a   : > { %v8172_v9 = vadd.f32 %v8171_v55, %v8170_v58  ;;  %v8261_v20 = vmul.f32 %v8229_v14, %v5386_v63  ;;  %v8116_v12 = vpop.permute.xlu1 %8115 }
 0x22b   : > { %v8148_v50 = vmul.f32 %v8116_v12, %v5386_v63  ;;  %v6078_v52 = vpop.f32.mrf.mxu0 }
 0x22c   : > { %v8286_v1 = vsel %vm7928_vm14, %v8261_v20, 0.0  ;;  %v6079_v43 = vadd.f32 %v6078_v52, %v6003_v3  ;;  %v6153_v7 = vpop.f32.mrf.mxu1 }
 0x22d   : > { %v8287_v25 = vadd.f32 %v8286_v1, %v8285_v10  ;;  %v8233_v57 = vpop.permute.xlu0 %8232  ;;  %v8173_v41 = vsel %vm7928_vm14, %v8148_v50, 0.0  ;;  %v9233_v37 = vpop.f32.mrf.mxu0 }
 0x22e   : > { %v8174_v53 = vadd.f32 %v8173_v41, %v8172_v9  ;;  %v8262_v38 = vmul.f32 %v8233_v57, %v5845_v19  ;;  %v8120_v5 = vpop.permute.xlu1 %8119  ;;  %v6154_v27 = vadd.f32 %v6153_v7, %v6079_v43  ;;  %v9240_v0 = vpop.f32.mrf.mxu1 }
 0x22f   : > { %v8149_v56 = vmul.f32 %v8120_v5, %v5845_v19 }
 0x230   : > { %v8288_v44 = vsel %vm7928_vm14, %v8262_v38, 0.0 }
 0x231   : > { %v11126_v13 = vadd.f32 %v8288_v44, %v8287_v25  ;;  %v8175_v63 = vsel %vm7928_vm14, %v8149_v56, 0.0  ;;  %v6230_v39 = vpop.f32.mrf.mxu0  ;;  %v8237_v7 = vpop.permute.xlu0 %8236 }
 0x232   : > { %v11129_v21 = vadd.f32 %v8175_v63, %v8174_v53  ;;  %v6231_v32 = vadd.f32 %v6230_v39, %v6154_v27  ;;  %v6303_v30 = vpop.f32.mrf.mxu1  ;;  %v8124_v25 = vpop.permute.xlu1 %8123 }
 0x233   : > { %v9247_v62 = vpop.f32.mrf.mxu0 }
 0x234   : > { %v6304_v22 = vadd.f32 %v6303_v30, %v6231_v32  ;;  %v9254_v8 = vpop.f32.mrf.mxu1 }
 0x235   : > { %v8241_v0 = vpop.permute.xlu0 %8240  ;;  %v11249_v8 = vld [vmem:[#allocation14_spill] sm:$0xff] }
 0x236   : > { %v8037_v58 = vmul.f32 %v10726_v31, %v6304_v22  ;;  %v8128_v56 = vpop.permute.xlu1 %8127  ;;  %v7924_v44 = vmul.f32 %v10489_v18, %v6304_v22  ;;  %v8150_v63 = vmul.f32 %v8124_v25, %v6304_v22  ;;  %v8263_v39 = vmul.f32 %v8237_v7, %v6304_v22 }
 0x238   : > { %v8064_v26 = vsel %vm7928_vm14, %v8037_v58, 0.0  ;;  %v6380_v51 = vpop.f32.mrf.mxu0  ;;  %v6461_v59 = vpop.f32.mrf.mxu1  ;;  %v8177_v18 = vsel %vm7928_vm14, %v8150_v63, 0.0 }
 0x239   : > { %v8065_v35 = vadd.f32 %v8064_v26, %v8063_v23  ;;  %v6462_v17 = vadd.f32 %v6461_v59, %v6380_v51 }
 0x23a   : > { %v9261_v46 = vpop.f32.mrf.mxu0  ;;  %v9268_v47 = vpop.f32.mrf.mxu1 }
 0x23b   : > { %v8245_v46 = vpop.permute.xlu0 %8244  ;;  %v7952_v47 = vsel %vm7928_vm14, %v7924_v44, 0.0 }
 0x23e   : > { %v6537_v60 = vpop.f32.mrf.mxu0  ;;  %v6612_v11 = vpop.f32.mrf.mxu1 }
 0x23f   : > { %v6538_v40 = vadd.f32 %v6537_v60, %v6462_v17  ;;  %v8132_v60 = vpop.permute.xlu1 %8131 }
 0x240   : > { %v9275_v6 = vpop.f32.mrf.mxu0  ;;  %v9282_v49 = vpop.f32.mrf.mxu1 }
 0x241   : > { %v6613_v45 = vadd.f32 %v6612_v11, %v6538_v40  ;;  %v8290_v11 = vsel %vm7928_vm14, %v8263_v39, 0.0  ;;  %v11250_v6 = vld [vmem:[#allocation13_spill] sm:$0xff] }
 0x244   : > { %v6689_v19 = vpop.f32.mrf.mxu0  ;;  %v6762_v16 = vpop.f32.mrf.mxu1 }
 0x245   : > { %v6690_v29 = vadd.f32 %v6689_v19, %v6613_v45 }
 0x246   : > { %v9289_v2 = vpop.f32.mrf.mxu0  ;;  %v9296_v36 = vpop.f32.mrf.mxu1 }
 0x247   : > { %v6763_v42 = vadd.f32 %v6762_v16, %v6690_v29 }
 0x249   : > { %v8038_v9 = vmul.f32 %v10704_v28, %v6763_v42  ;;  %v7925_v58 = vmul.f32 %v11249_v8, %v6763_v42  ;;  %v8151_v26 = vmul.f32 %v8128_v56, %v6763_v42  ;;  %v8264_v51 = vmul.f32 %v8241_v0, %v6763_v42 }
 0x24a   : > { %v6839_v48 = vpop.f32.mrf.mxu0 }
 0x24b   : > { %v6920_v31 = vpop.f32.mrf.mxu1  ;;  %v8066_v1 = vsel %vm7928_vm14, %v8038_v9, 0.0  ;;  %v7954_v40 = vsel %vm7928_vm14, %v7925_v58, 0.0  ;;  %v8179_v2 = vsel %vm7928_vm14, %v8151_v26, 0.0  ;;  %v8292_v36 = vsel %vm7928_vm14, %v8264_v51, 0.0 }
 0x24c   : > { %v9303_v61 = vpop.f32.mrf.mxu0  ;;  %v6921_v15 = vadd.f32 %v6920_v31, %v6839_v48  ;;  %v8067_v41 = vadd.f32 %v8066_v1, %v8065_v35  ;;  %v7953_v31 = vadd.f32 %v7952_v47, %v11119_v34  ;;  %v11251_v34 = vld [vmem:[#allocation15_spill] sm:$0xff] }
 0x24d   : > { %v9310_v4 = vpop.f32.mrf.mxu1  ;;  %v8178_v61 = vadd.f32 %v8177_v18, %v11129_v21 }
 0x24e   : > { %v8291_v4 = vadd.f32 %v8290_v11, %v11126_v13  ;;  %v11252_v13 = vld [vmem:[#allocation16_spill] sm:$0xff] }
 0x24f   : > { %v8180_v9 = vadd.f32 %v8179_v2, %v8178_v61 }
 0x250   : > { %v6996_v23 = vpop.f32.mrf.mxu0 }
 0x251   : > { %v6997_v54 = vadd.f32 %v6996_v23, %v6921_v15  ;;  %v7071_v33 = vpop.f32.mrf.mxu1 }
 0x252   : > { %v9317_v10 = vpop.f32.mrf.mxu0 }
 0x253   : > { %v9324_v55 = vpop.f32.mrf.mxu1  ;;  %v7072_v14 = vadd.f32 %v7071_v33, %v6997_v54  ;;  %v8249_v10 = vpop.permute.xlu0 %8248 }
 0x254   : > { %v8136_v55 = vpop.permute.xlu1 %8135 }
 0x257   : > { %v7148_v20 = vpop.f32.mrf.mxu0  ;;  %v7221_v12 = vpop.f32.mrf.mxu1 }
 0x258   : > { %v7149_v3 = vadd.f32 %v7148_v20, %v7072_v14  ;;  %v7955_v14 = vadd.f32 %v7954_v40, %v7953_v31  ;;  %v8293_v20 = vadd.f32 %v8292_v36, %v8291_v4 }
 0x259   : > { %v9331_v50 = vpop.f32.mrf.mxu0  ;;  %v9338_v52 = vpop.f32.mrf.mxu1 }
 0x25a   : > { %v7222_v43 = vadd.f32 %v7221_v12, %v7149_v3 }
 0x25c   : > { %v8039_v57 = vmul.f32 %v10750_v24, %v7222_v43  ;;  %v7926_v49 = vmul.f32 %v11250_v6, %v7222_v43  ;;  %v8152_v17 = vmul.f32 %v8132_v60, %v7222_v43  ;;  %v8265_v19 = vmul.f32 %v8245_v46, %v7222_v43 }
 0x25e   : > { %v8068_v37 = vsel %vm7928_vm14, %v8039_v57, 0.0  ;;  %v7298_v28 = vpop.f32.mrf.mxu0  ;;  %v7379_v53 = vpop.f32.mrf.mxu1  ;;  %v7956_v15 = vsel %vm7928_vm14, %v7926_v49, 0.0  ;;  %v8181_v23 = vsel %vm7928_vm14, %v8152_v17, 0.0  ;;  %v8294_v54 = vsel %vm7928_vm14, %v8265_v19, 0.0 }
 0x25f   : > { %v11137_v38 = vadd.f32 %v8068_v37, %v8067_v41  ;;  %v7380_v24 = vadd.f32 %v7379_v53, %v7298_v28  ;;  %v7957_v52 = vadd.f32 %v7956_v15, %v7955_v14  ;;  %v8182_v1 = vadd.f32 %v8181_v23, %v8180_v9 }
 0x260   : > { %v9345_v5 = vpop.f32.mrf.mxu0  ;;  %v9352_v27 = vpop.f32.mrf.mxu1  ;;  %v8295_v43 = vadd.f32 %v8294_v54, %v8293_v20 }
 0x264   : > { %v7455_v32 = vpop.f32.mrf.mxu0  ;;  %v7530_v30 = vpop.f32.mrf.mxu1 }
 0x265   : > { %v7456_v62 = vadd.f32 %v7455_v32, %v7380_v24 }
 0x266   : > { %v9359_v59 = vpop.f32.mrf.mxu0  ;;  %v9366_v35 = vpop.f32.mrf.mxu1 }
 0x267   : > { %v7531_v22 = vadd.f32 %v7530_v30, %v7456_v62 }
 0x269   : > { %v7607_v16 = vpop.f32.mrf.mxu0 }
 0x26a   : > { %v7608_v45 = vadd.f32 %v7607_v16, %v7531_v22  ;;  %v7680_v48 = vpop.f32.mrf.mxu1 }
 0x26b   : > { %v9373_v29 = vpop.f32.mrf.mxu0 }
 0x26c   : > { %v7681_v33 = vadd.f32 %v7680_v48, %v7608_v45  ;;  %v9380_v42 = vpop.f32.mrf.mxu1 }
 0x26e   : > { %v7927_v21 = vmul.f32 %v11251_v34, %v7681_v33  ;;  %v8040_v12 = vmul.f32 %v11252_v13, %v7681_v33  ;;  %v8153_v3 = vmul.f32 %v8136_v55, %v7681_v33  ;;  %v8266_v50 = vmul.f32 %v8249_v10, %v7681_v33 }
 0x270   : > { %v7958_v7 = vsel %vm7928_vm14, %v7927_v21, 0.0  ;;  %v8070_v25 = vsel %vm7928_vm14, %v8040_v12, 0.0  ;;  %v8183_v57 = vsel %vm7928_vm14, %v8153_v3, 0.0  ;;  %v8296_v41 = vsel %vm7928_vm14, %v8266_v50, 0.0 }
 0x271   : > { %v7959_v37 = vadd.f32 %v7958_v7, %v7957_v52  ;;  %v8071_v28 = vadd.f32 %v8070_v25, %v11137_v38  ;;  %v8184_v53 = vadd.f32 %v8183_v57, %v8182_v1  ;;  %v8297_v5 = vadd.f32 %v8296_v41, %v8295_v43 }
 0x273   : > { %7960 = vst.msk [vmem:[%s169_s27] sm:$0xf] %vm7928_vm14, %v7959_v37  ;;  %8405 = vst.msk [vmem:[%s169_s27 + $0x4] sm:$0xf] %vm7928_vm14, %v8071_v28 }
 0x274   : > { %8406 = vst.msk [vmem:[%s169_s27 + $0x8] sm:$0xf] %vm7928_vm14, %v8184_v53  ;;  %8407 = vst.msk [vmem:[%s169_s27 + $0xc] sm:$0xf] %vm7928_vm14, %v8297_v5 }
 0x275   : > { %9515 = shalt.err (!%p9512_p10)
}
 0x276   : > { %s9516_s5 = scalar_lea.hbm %s11177_s17, 256  ;;  %s9520_s10 = scalar_lea.hbm %s11228_s4, 768 }
 0x277   : > { %p9517_p11 = scmp.ne.s32.totalorder %s11177_s17, %s9516_s5  ;;  %p9521_p1 = scmp.lt.s32.totalorder %s11177_s17, %s11228_s4 }
 0x278   : > { %p9522_p3 = scmp.lt.s32.totalorder %s9520_s10, %s9516_s5 }
 0x279   : > { %p9518_p12 = pnand %p9517_p11, %p9650_p0 }
 0x27a   : > { %p9523_p2 = por %p9522_p3, %p9521_p1 }
 0x27b   : > { %p9519_p13 = pneg %p9518_p12 }
 0x27d   : > { %p9524_p4 = pnand %p9523_p2, %p9519_p13 }
 0x27f   : > { %9527 = shalt.err (!%p9524_p4)
}
 0x280   : > { %s9582_s12 = smov 64   ;;  %s9583_s13 = smov 4  }
 0x281   : > { %9387 = dma.vmem_to_hbm [thread:$0]  (%p9650_p0), %s11171_s16, 256, %s11177_s17, %s11185_s21, %s9582_s12, %s9582_s12, %s9583_s13  }
 0x282 PF: > { %p9399_p5 = scmp.ge.s32.totalorder %s9568_s26, 2  ;;  %s8330_s15 = sand.u32 1, %s9556_s1  }
 0x283   : > { %p11253_p6 = scmp.ne.s32.totalorder %s11235_s8, 0  ;;  %s8331_s27 = scalar_lea.sflag [#allocation6], %s8330_s15 }
 0x285   : > { %p9394_p7 = pnand %p9399_p5, %p11253_p6 }
 0x287   : > { %p9395_p8 = pneg %p9394_p7 }
 0x289   : > { %9551 = dma.done.wait (%p9395_p8), %s8331_s27, 256  }
 0x28a   : > { %9553 = vsyncadd (%p9395_p8), %s8331_s27, 4294967040  ;;  %p25_p9 = scmp.ge.s32.totalorder %s9640_s29, 5   ;;  %s11254_s1 = smov %s9560_s24 }
 0x28b   : > { %s11255_s24 = smov %s9564_s25  ;;  %s11256_s25 = smov %s9671_s14 }
 0x28c   : > { %s11257_s26 = smov %s9640_s29  ;;  %27 = sbr.rel (!%p25_p9) target bundleno = 29 (0x1d), region = 71 }
 0x291   :  { %8336 = vsyncpa [#allocation6], 1 }
 0x292   :  { %8338 = vsyncpa [#allocation6 + $0x1], 1 }
 0x293   :  { %8339 = vsyncpa [#allocation7], 1 }
 0x294   :  { %8341 = vsyncpa [#allocation7 + $0x1], 1 }

</bundles_post_ra>
